<compile_context>
chip_gen: v7x
topology: tpu7x:2x2x1
jax: 0.10.0
libtpu: 0.0.40
codegen_flags: <defaults>
</compile_context>

<pallas_src>
import functools

import numpy as np
import jax
import jax.numpy as jnp
from jax import lax
from jax.experimental import pallas as pl
from jax.experimental.pallas import tpu as pltpu

MASK_VALUE = -10000000.0


def _mha_kernel(x_q_ref, x_kv_ref, pad_ref,
                wq_ref, bq_ref, wkv_ref, bkv_ref, wfc_ref, bfc_ref,
                out_ref, *, nhead, dk, dv, mxu_dtype):
    f32 = jnp.float32

    xq = x_q_ref[...].astype(mxu_dtype)          # [TQ, dmodel]
    xkv = x_kv_ref[...].astype(mxu_dtype)        # [S, dmodel]
    pad = pad_ref[...]                           # [1, S] float, 1 = pad key
    keep = 1.0 - pad                             # [1, S]

    # --- projections (MXU, bf16 operands, f32 accumulation) ---
    # Q for this query tile only; 1/sqrt(dk) is pre-folded into wq/bq on the host.
    q = jnp.dot(xq, wq_ref[...].astype(mxu_dtype),
                preferred_element_type=f32) + bq_ref[...]           # [TQ, nhead*dk]
    # Fused K+V projection for the full sequence (one wide MXU pass).
    kv = jnp.dot(xkv, wkv_ref[...].astype(mxu_dtype),
                 preferred_element_type=f32) + bkv_ref[...]         # [S, nhead*(dk+dv)]

    q = q.astype(mxu_dtype)
    kv = kv.astype(mxu_dtype)
    v_off = nhead * dk

    acc = jnp.zeros(out_ref.shape, dtype=f32)    # [TQ, dmodel] output-proj accumulator
    for h in range(nhead):                       # static unroll, nhead is small
        qh = q[:, h * dk:(h + 1) * dk]           # [TQ, dk]
        kh = kv[:, h * dk:(h + 1) * dk]          # [S, dk]
        vh = kv[:, v_off + h * dv:v_off + (h + 1) * dv]             # [S, dv]

        # scores = qh @ kh^T : contract last dims directly, no explicit transpose.
        s = lax.dot_general(qh, kh, (((1,), (1,)), ((), ())),
                            preferred_element_type=f32)             # [TQ, S] f32
        s = jnp.where(pad > 0.0, MASK_VALUE, s)                     # mask_logits(score, mask)

        # softmax over keys, kept in f32 (EUP exp + approx reciprocal)
        m = jnp.max(s, axis=-1, keepdims=True)
        e = jnp.exp(s - m)
        p = e * pl.reciprocal(jnp.sum(e, axis=-1, keepdims=True), approx=True)
        p = p * keep                                                # mask_logits(attn, mask, 0)
        # TODO(synk): dropout on p skipped (eval mode identity).

        oh = jnp.dot(p.astype(mxu_dtype), vh, preferred_element_type=f32)   # [TQ, dv]
        # Accumulate this head's slice of the output projection instead of
        # concatenating heads (wfc is passed head-major as [nhead, dv, dmodel]).
        acc = acc + jnp.dot(oh.astype(mxu_dtype), wfc_ref[h].astype(mxu_dtype),
                            preferred_element_type=f32)             # [TQ, dmodel]

    out_ref[...] = (acc + bfc_ref[...]).astype(out_ref.dtype)


def multi_head_attention(x, key_pad_mask, params, *, nhead, dk, dv,
                         mxu_dtype=jnp.bfloat16, q_block=128):
    """x: [b, slen, dmodel]; key_pad_mask: [b, slen] (1 = pad). Returns [b, slen, dmodel]."""
    b, slen, dmodel = x.shape
    wq, bq, wk, bk, wv, bv, wfc, bfc = params

    # Fold the 1/sqrt(dk) softmax scale into the Q projection (free at runtime).
    inv_scale = jnp.float32(1.0 / np.power(dk, 0.5))
    wq_s = (wq * inv_scale).astype(jnp.float32)
    bq_s = (bq * inv_scale).reshape(1, -1).astype(jnp.float32)
    # Fuse K and V projections into one wide matmul.
    wkv = jnp.concatenate([wk, wv], axis=1).astype(jnp.float32)     # [dmodel, nhead*(dk+dv)]
    bkv = jnp.concatenate([bk, bv]).reshape(1, -1).astype(jnp.float32)
    # Head-major output-projection weight -> lane-dense [dv, dmodel] slabs per head.
    wfc_h = wfc.reshape(nhead, dv, dmodel).astype(jnp.float32)
    bfc2 = bfc.reshape(1, -1).astype(jnp.float32)
    # Key-pad vector (broadcast in-kernel) instead of a dense [b, slen, slen] mask.
    pad3 = key_pad_mask.reshape(b, 1, slen).astype(jnp.float32)

    # Query tiling: (8,128)-friendly tile, falls back to the full sequence if slen
    # is not a multiple of the tile.
    tq = q_block if (slen % q_block == 0) else slen
    num_q = slen // tq

    kernel = functools.partial(_mha_kernel, nhead=nhead, dk=dk, dv=dv,
                               mxu_dtype=mxu_dtype)

    def build(single_buffer_weights):
        def wspec(a):
            nd = a.ndim
            imap = lambda bi, qi, _nd=nd: (0,) * _nd
            if single_buffer_weights:
                # Resident weights (constant index_map) don't need double-buffering;
                # halves their VMEM footprint (matters on v7x's 64 MiB VMEM).
                return pl.BlockSpec(a.shape, imap, pipeline_mode=pl.Buffered(1))
            return pl.BlockSpec(a.shape, imap)

        return pl.pallas_call(
            kernel,
            out_shape=jax.ShapeDtypeStruct((b, slen, dmodel), x.dtype),
            grid_spec=pltpu.PrefetchScalarGridSpec(
                num_scalar_prefetch=0,
                grid=(b, num_q),
                in_specs=[
                    pl.BlockSpec((None, tq, dmodel), lambda bi, qi: (bi, qi, 0)),   # x (Q rows)
                    pl.BlockSpec((None, slen, dmodel), lambda bi, qi: (bi, 0, 0)),  # x (K/V rows)
                    pl.BlockSpec((None, 1, slen), lambda bi, qi: (bi, 0, 0)),       # key-pad
                    wspec(wq_s), wspec(bq_s),
                    wspec(wkv), wspec(bkv),
                    wspec(wfc_h), wspec(bfc2),
                ],
                out_specs=pl.BlockSpec((None, tq, dmodel), lambda bi, qi: (bi, qi, 0)),
            ),
            compiler_params=pltpu.CompilerParams(
                dimension_semantics=("parallel", "parallel"),
                vmem_limit_bytes=48 * 1024 * 1024,   # headroom under v7x's 64 MiB physical
            ),
        )

    args = (x, x, pad3, wq_s, bq_s, wkv, bkv, wfc_h, bfc2)
    try:
        return jax.block_until_ready(build(True)(*args))
    except Exception:
        # Fallback if this Pallas build rejects single-buffered (Buffered(1)) specs.
        return jax.block_until_ready(build(False)(*args))


def _reference(x, mask, params, *, nhead, dk, dv):
    """Plain-JAX reference mirroring the PyTorch forward (eval mode), dense mask."""
    wq, bq, wk, bk, wv, bv, wfc, bfc = params
    b, slen, dmodel = x.shape
    q = (x @ wq + bq).reshape(b, slen, nhead, dk)
    k = (x @ wk + bk).reshape(b, slen, nhead, dk)
    v = (x @ wv + bv).reshape(b, slen, nhead, dv)
    q = jnp.transpose(q, (2, 0, 1, 3)).reshape(-1, slen, dk)
    k = jnp.transpose(k, (2, 0, 1, 3)).reshape(-1, slen, dk)
    v = jnp.transpose(v, (2, 0, 1, 3)).reshape(-1, slen, dv)
    m = jnp.tile(mask, (nhead, 1, 1))
    score = jnp.einsum('bqd,bkd->bqk', q, k) / np.power(dk, 0.5)
    score = score * (1 - m) + m * MASK_VALUE
    attn = jax.nn.softmax(score, axis=2)
    attn = attn * (1 - m)
    att = jnp.einsum('bqk,bkd->bqd', attn, v)
    att = att.reshape(nhead, b, slen, dv)
    att = jnp.transpose(att, (1, 2, 0, 3)).reshape(b, slen, nhead * dv)
    return att @ wfc + bfc


if __name__ == "__main__":
    # Small, deterministic config
    b, slen, dmodel = 2, 8, 32
    nhead, dk, dv = 2, 16, 16

    key = jax.random.PRNGKey(0)
    ks = jax.random.split(key, 10)

    def init_linear(kw, kb, fan_in, fan_out):
        bound = 1.0 / np.sqrt(fan_in)
        w = jax.random.uniform(kw, (fan_in, fan_out), jnp.float32, -bound, bound)
        bias = jax.random.uniform(kb, (fan_out,), jnp.float32, -bound, bound)
        return w, bias

    wq, bq = init_linear(ks[0], ks[1], dmodel, nhead * dk)
    wk, bk = init_linear(ks[2], ks[3], dmodel, nhead * dk)
    wv, bv = init_linear(ks[4], ks[5], dmodel, nhead * dv)
    wfc, bfc = init_linear(ks[6], ks[7], nhead * dv, dmodel)
    params = (wq, bq, wk, bk, wv, bv, wfc, bfc)

    x = jax.random.normal(ks[8], (b, slen, dmodel), jnp.float32)

    # key-padding mask: last 2 positions of every sequence are pad (1 = pad)
    key_pad = jnp.broadcast_to(
        (jnp.arange(slen) >= slen - 2).astype(jnp.float32)[None, :], (b, slen))
    dense_mask = jnp.broadcast_to(key_pad[:, None, :], (b, slen, slen))  # for the reference

    out = multi_head_attention(x, key_pad, params, nhead=nhead, dk=dk, dv=dv)
    out = jax.block_until_ready(out)

    ref = _reference(x, dense_mask, params, nhead=nhead, dk=dk, dv=dv)

    # bf16 MXU operands (f32 accumulation / f32 softmax) -> loosened tolerance vs f32 ref.
    np.testing.assert_allclose(np.asarray(out, dtype=np.float32), np.asarray(ref),
                               rtol=2e-2, atol=2e-2)

    print("KERNEL_OK")
</pallas_src>

<mosaic_0001>
module attributes {stable_mosaic.version = 11 : i64} {
  func.func @_mha_kernel(%arg0: i32, %arg1: i32, %arg2: memref<1x8x32xf32, #tpu.memory_space<vmem>>, %arg3: memref<1x8x32xf32, #tpu.memory_space<vmem>>, %arg4: memref<1x1x8xf32, #tpu.memory_space<vmem>>, %arg5: memref<32x32xf32, #tpu.memory_space<vmem>>, %arg6: memref<1x32xf32, #tpu.memory_space<vmem>>, %arg7: memref<32x64xf32, #tpu.memory_space<vmem>>, %arg8: memref<1x64xf32, #tpu.memory_space<vmem>>, %arg9: memref<2x16x32xf32, #tpu.memory_space<vmem>>, %arg10: memref<1x32xf32, #tpu.memory_space<vmem>>, %arg11: memref<1x8x32xf32, #tpu.memory_space<vmem>>) attributes {dimension_semantics = [#tpu.dimension_semantics<parallel>, #tpu.dimension_semantics<parallel>], iteration_bounds = array<i64: 2, 1>, scalar_prefetch = 0 : i64, scratch_operands = 0 : i64, tpu.core_type = #tpu.core_type<tc>, window_params = [{transform_indices = @transform_0, window_bounds = array<i64: 1, 8, 32>}, {transform_indices = @transform_1, window_bounds = array<i64: 1, 8, 32>}, {transform_indices = @transform_2, window_bounds = array<i64: 1, 1, 8>}, {pipeline_mode = #tpu.pipeline_mode<synchronous>, transform_indices = @transform_3, window_bounds = array<i64: 32, 32>}, {pipeline_mode = #tpu.pipeline_mode<synchronous>, transform_indices = @transform_4, window_bounds = array<i64: 1, 32>}, {pipeline_mode = #tpu.pipeline_mode<synchronous>, transform_indices = @transform_5, window_bounds = array<i64: 32, 64>}, {pipeline_mode = #tpu.pipeline_mode<synchronous>, transform_indices = @transform_6, window_bounds = array<i64: 1, 64>}, {pipeline_mode = #tpu.pipeline_mode<synchronous>, transform_indices = @transform_7, window_bounds = array<i64: 2, 16, 32>}, {pipeline_mode = #tpu.pipeline_mode<synchronous>, transform_indices = @transform_8, window_bounds = array<i64: 1, 32>}, {transform_indices = @transform_9, window_bounds = array<i64: 1, 8, 32>}]} {
    %c0 = arith.constant 0 : index
    %c0_0 = arith.constant 0 : index
    %c0_1 = arith.constant 0 : index
    %0 = vector.load %arg2[%c0, %c0_0, %c0_1] : memref<1x8x32xf32, #tpu.memory_space<vmem>>, vector<1x8x32xf32>
    %1 = vector.shape_cast %0 : vector<1x8x32xf32> to vector<8x32xf32>
    %2 = arith.truncf %1 : vector<8x32xf32> to vector<8x32xbf16>
    %c0_2 = arith.constant 0 : index
    %c0_3 = arith.constant 0 : index
    %c0_4 = arith.constant 0 : index
    %3 = vector.load %arg3[%c0_2, %c0_3, %c0_4] : memref<1x8x32xf32, #tpu.memory_space<vmem>>, vector<1x8x32xf32>
    %4 = vector.shape_cast %3 : vector<1x8x32xf32> to vector<8x32xf32>
    %5 = arith.truncf %4 : vector<8x32xf32> to vector<8x32xbf16>
    %c0_5 = arith.constant 0 : index
    %c0_6 = arith.constant 0 : index
    %c0_7 = arith.constant 0 : index
    %6 = vector.load %arg4[%c0_5, %c0_6, %c0_7] : memref<1x1x8xf32, #tpu.memory_space<vmem>>, vector<1x1x8xf32>
    %7 = vector.shape_cast %6 : vector<1x1x8xf32> to vector<1x8xf32>
    %cst = arith.constant 1.000000e+00 : f32
    %8 = vector.broadcast %cst : f32 to vector<1x8xf32>
    %9 = arith.subf %8, %7 : vector<1x8xf32>
    %c0_8 = arith.constant 0 : index
    %c0_9 = arith.constant 0 : index
    %10 = vector.load %arg5[%c0_8, %c0_9] : memref<32x32xf32, #tpu.memory_space<vmem>>, vector<32x32xf32>
    %11 = arith.truncf %10 : vector<32x32xf32> to vector<32x32xbf16>
    %cst_10 = arith.constant dense<0.000000e+00> : vector<8x32xf32>
    %12 = tpu.matmul %2, %11, %cst_10 {dimension_numbers = #tpu.dot_dimension_numbers<[1], [0], [0], [1], [0, 0, 1, 1], [], []>} : vector<8x32xbf16>, vector<32x32xbf16>, vector<8x32xf32> -> vector<8x32xf32>
    %c0_11 = arith.constant 0 : index
    %c0_12 = arith.constant 0 : index
    %13 = vector.load %arg6[%c0_11, %c0_12] : memref<1x32xf32, #tpu.memory_space<vmem>>, vector<1x32xf32>
    %14 = vector.broadcast %13 : vector<1x32xf32> to vector<8x32xf32>
    %15 = arith.addf %12, %14 : vector<8x32xf32>
    %c0_13 = arith.constant 0 : index
    %c0_14 = arith.constant 0 : index
    %16 = vector.load %arg7[%c0_13, %c0_14] : memref<32x64xf32, #tpu.memory_space<vmem>>, vector<32x64xf32>
    %17 = arith.truncf %16 : vector<32x64xf32> to vector<32x64xbf16>
    %cst_15 = arith.constant dense<0.000000e+00> : vector<8x64xf32>
    %18 = tpu.matmul %5, %17, %cst_15 {dimension_numbers = #tpu.dot_dimension_numbers<[1], [0], [0], [1], [0, 0, 1, 1], [], []>} : vector<8x32xbf16>, vector<32x64xbf16>, vector<8x64xf32> -> vector<8x64xf32>
    %c0_16 = arith.constant 0 : index
    %c0_17 = arith.constant 0 : index
    %19 = vector.load %arg8[%c0_16, %c0_17] : memref<1x64xf32, #tpu.memory_space<vmem>>, vector<1x64xf32>
    %20 = vector.broadcast %19 : vector<1x64xf32> to vector<8x64xf32>
    %21 = arith.addf %18, %20 : vector<8x64xf32>
    %22 = arith.truncf %15 : vector<8x32xf32> to vector<8x32xbf16>
    %23 = arith.truncf %21 : vector<8x64xf32> to vector<8x64xbf16>
    %cst_18 = arith.constant 0.000000e+00 : f32
    %24 = vector.broadcast %cst_18 : f32 to vector<8x32xf32>
    %25 = vector.extract_strided_slice %22 {offsets = [0, 0], sizes = [8, 16], strides = [1, 1]} : vector<8x32xbf16> to vector<8x16xbf16>
    %26 = vector.extract_strided_slice %23 {offsets = [0, 0], sizes = [8, 16], strides = [1, 1]} : vector<8x64xbf16> to vector<8x16xbf16>
    %27 = vector.extract_strided_slice %23 {offsets = [0, 32], sizes = [8, 16], strides = [1, 1]} : vector<8x64xbf16> to vector<8x16xbf16>
    %cst_19 = arith.constant dense<0.000000e+00> : vector<8x8xf32>
    %28 = tpu.matmul %25, %26, %cst_19 {dimension_numbers = #tpu.dot_dimension_numbers<[1], [1], [0], [0], [0, 0, 1, 0], [], []>} : vector<8x16xbf16>, vector<8x16xbf16>, vector<8x8xf32> -> vector<8x8xf32>
    %cst_20 = arith.constant 0.000000e+00 : f32
    %29 = vector.broadcast %cst_20 : f32 to vector<1x8xf32>
    %30 = arith.cmpf ogt, %7, %29 : vector<1x8xf32>
    %cst_21 = arith.constant -1.000000e+07 : f32
    %31 = vector.shape_cast %30 : vector<1x8xi1> to vector<1x8xi1>
    %32 = vector.broadcast %31 : vector<1x8xi1> to vector<8x8xi1>
    %33 = vector.broadcast %cst_21 : f32 to vector<8x8xf32>
    %34 = arith.select %32, %33, %28 : vector<8x8xi1>, vector<8x8xf32>
    %cst_22 = arith.constant dense<0xFF800000> : vector<8xf32>
    %35 = vector.multi_reduction <maximumf>, %34, %cst_22 [1] : vector<8x8xf32> to vector<8xf32>
    %36 = vector.shape_cast %35 : vector<8xf32> to vector<8x1xf32>
    %37 = vector.broadcast %36 : vector<8x1xf32> to vector<8x8xf32>
    %38 = arith.subf %34, %37 : vector<8x8xf32>
    %39 = math.exp %38 : vector<8x8xf32>
    %cst_23 = arith.constant dense<0.000000e+00> : vector<8xf32>
    %40 = vector.multi_reduction <add>, %39, %cst_23 [1] : vector<8x8xf32> to vector<8xf32>
    %41 = vector.shape_cast %40 : vector<8xf32> to vector<8x1xf32>
    %42 = tpu.reciprocal %41 {approx = true} : vector<8x1xf32> -> vector<8x1xf32>
    %43 = vector.broadcast %42 : vector<8x1xf32> to vector<8x8xf32>
    %44 = arith.mulf %39, %43 : vector<8x8xf32>
    %45 = vector.broadcast %9 : vector<1x8xf32> to vector<8x8xf32>
    %46 = arith.mulf %44, %45 : vector<8x8xf32>
    %47 = arith.truncf %46 : vector<8x8xf32> to vector<8x8xbf16>
    %cst_24 = arith.constant dense<0.000000e+00> : vector<8x16xf32>
    %48 = tpu.matmul %47, %27, %cst_24 {dimension_numbers = #tpu.dot_dimension_numbers<[1], [0], [0], [1], [0, 0, 1, 1], [], []>} : vector<8x8xbf16>, vector<8x16xbf16>, vector<8x16xf32> -> vector<8x16xf32>
    %49 = arith.truncf %48 : vector<8x16xf32> to vector<8x16xbf16>
    %c0_25 = arith.constant 0 : index
    %c0_26 = arith.constant 0 : index
    %c0_27 = arith.constant 0 : index
    %50 = vector.load %arg9[%c0_25, %c0_26, %c0_27] : memref<2x16x32xf32, #tpu.memory_space<vmem>>, vector<1x16x32xf32>
    %51 = vector.shape_cast %50 : vector<1x16x32xf32> to vector<16x32xf32>
    %52 = arith.truncf %51 : vector<16x32xf32> to vector<16x32xbf16>
    %cst_28 = arith.constant dense<0.000000e+00> : vector<8x32xf32>
    %53 = tpu.matmul %49, %52, %cst_28 {dimension_numbers = #tpu.dot_dimension_numbers<[1], [0], [0], [1], [0, 0, 1, 1], [], []>} : vector<8x16xbf16>, vector<16x32xbf16>, vector<8x32xf32> -> vector<8x32xf32>
    %54 = arith.addf %24, %53 : vector<8x32xf32>
    %55 = vector.extract_strided_slice %22 {offsets = [0, 16], sizes = [8, 16], strides = [1, 1]} : vector<8x32xbf16> to vector<8x16xbf16>
    %56 = vector.extract_strided_slice %23 {offsets = [0, 16], sizes = [8, 16], strides = [1, 1]} : vector<8x64xbf16> to vector<8x16xbf16>
    %57 = vector.extract_strided_slice %23 {offsets = [0, 48], sizes = [8, 16], strides = [1, 1]} : vector<8x64xbf16> to vector<8x16xbf16>
    %cst_29 = arith.constant dense<0.000000e+00> : vector<8x8xf32>
    %58 = tpu.matmul %55, %56, %cst_29 {dimension_numbers = #tpu.dot_dimension_numbers<[1], [1], [0], [0], [0, 0, 1, 0], [], []>} : vector<8x16xbf16>, vector<8x16xbf16>, vector<8x8xf32> -> vector<8x8xf32>
    %cst_30 = arith.constant 0.000000e+00 : f32
    %59 = vector.broadcast %cst_30 : f32 to vector<1x8xf32>
    %60 = arith.cmpf ogt, %7, %59 : vector<1x8xf32>
    %cst_31 = arith.constant -1.000000e+07 : f32
    %61 = vector.shape_cast %60 : vector<1x8xi1> to vector<1x8xi1>
    %62 = vector.broadcast %61 : vector<1x8xi1> to vector<8x8xi1>
    %63 = vector.broadcast %cst_31 : f32 to vector<8x8xf32>
    %64 = arith.select %62, %63, %58 : vector<8x8xi1>, vector<8x8xf32>
    %cst_32 = arith.constant dense<0xFF800000> : vector<8xf32>
    %65 = vector.multi_reduction <maximumf>, %64, %cst_32 [1] : vector<8x8xf32> to vector<8xf32>
    %66 = vector.shape_cast %65 : vector<8xf32> to vector<8x1xf32>
    %67 = vector.broadcast %66 : vector<8x1xf32> to vector<8x8xf32>
    %68 = arith.subf %64, %67 : vector<8x8xf32>
    %69 = math.exp %68 : vector<8x8xf32>
    %cst_33 = arith.constant dense<0.000000e+00> : vector<8xf32>
    %70 = vector.multi_reduction <add>, %69, %cst_33 [1] : vector<8x8xf32> to vector<8xf32>
    %71 = vector.shape_cast %70 : vector<8xf32> to vector<8x1xf32>
    %72 = tpu.reciprocal %71 {approx = true} : vector<8x1xf32> -> vector<8x1xf32>
    %73 = vector.broadcast %72 : vector<8x1xf32> to vector<8x8xf32>
    %74 = arith.mulf %69, %73 : vector<8x8xf32>
    %75 = vector.broadcast %9 : vector<1x8xf32> to vector<8x8xf32>
    %76 = arith.mulf %74, %75 : vector<8x8xf32>
    %77 = arith.truncf %76 : vector<8x8xf32> to vector<8x8xbf16>
    %cst_34 = arith.constant dense<0.000000e+00> : vector<8x16xf32>
    %78 = tpu.matmul %77, %57, %cst_34 {dimension_numbers = #tpu.dot_dimension_numbers<[1], [0], [0], [1], [0, 0, 1, 1], [], []>} : vector<8x8xbf16>, vector<8x16xbf16>, vector<8x16xf32> -> vector<8x16xf32>
    %79 = arith.truncf %78 : vector<8x16xf32> to vector<8x16xbf16>
    %c1 = arith.constant 1 : index
    %c0_35 = arith.constant 0 : index
    %c0_36 = arith.constant 0 : index
    %80 = vector.load %arg9[%c1, %c0_35, %c0_36] : memref<2x16x32xf32, #tpu.memory_space<vmem>>, vector<1x16x32xf32>
    %81 = vector.shape_cast %80 : vector<1x16x32xf32> to vector<16x32xf32>
    %82 = arith.truncf %81 : vector<16x32xf32> to vector<16x32xbf16>
    %cst_37 = arith.constant dense<0.000000e+00> : vector<8x32xf32>
    %83 = tpu.matmul %79, %82, %cst_37 {dimension_numbers = #tpu.dot_dimension_numbers<[1], [0], [0], [1], [0, 0, 1, 1], [], []>} : vector<8x16xbf16>, vector<16x32xbf16>, vector<8x32xf32> -> vector<8x32xf32>
    %84 = arith.addf %54, %83 : vector<8x32xf32>
    %c0_38 = arith.constant 0 : index
    %c0_39 = arith.constant 0 : index
    %85 = vector.load %arg10[%c0_38, %c0_39] : memref<1x32xf32, #tpu.memory_space<vmem>>, vector<1x32xf32>
    %86 = vector.broadcast %85 : vector<1x32xf32> to vector<8x32xf32>
    %87 = arith.addf %84, %86 : vector<8x32xf32>
    %c0_40 = arith.constant 0 : index
    %c0_41 = arith.constant 0 : index
    %c0_42 = arith.constant 0 : index
    %88 = vector.load %arg11[%c0_40, %c0_41, %c0_42] : memref<1x8x32xf32, #tpu.memory_space<vmem>>, vector<1x8x32xf32>
    %89 = vector.shape_cast %88 : vector<1x8x32xf32> to vector<8x32xf32>
    %90 = vector.shape_cast %87 : vector<8x32xf32> to vector<1x8x32xf32>
    tpu.vector_store %arg11[%c0_40, %c0_41, %c0_42], %90 {strides = array<i32>} : memref<1x8x32xf32, #tpu.memory_space<vmem>>, vector<1x8x32xf32>,
    return
  }
  func.func @transform_0(%arg0: i32, %arg1: i32) -> (i32, i32, i32) {
    %c0_i32 = arith.constant 0 : i32
    %c0_i32_0 = arith.constant 0 : i32
    return %arg0, %arg1, %c0_i32 : i32, i32, i32
  }
  func.func @transform_1(%arg0: i32, %arg1: i32) -> (i32, i32, i32) {
    %c0_i32 = arith.constant 0 : i32
    %c0_i32_0 = arith.constant 0 : i32
    %c0_i32_1 = arith.constant 0 : i32
    return %arg0, %c0_i32, %c0_i32_0 : i32, i32, i32
  }
  func.func @transform_2(%arg0: i32, %arg1: i32) -> (i32, i32, i32) {
    %c0_i32 = arith.constant 0 : i32
    %c0_i32_0 = arith.constant 0 : i32
    %c0_i32_1 = arith.constant 0 : i32
    return %arg0, %c0_i32, %c0_i32_0 : i32, i32, i32
  }
  func.func @transform_3(%arg0: i32, %arg1: i32) -> (i32, i32) {
    %c0_i32 = arith.constant 0 : i32
    %c0_i32_0 = arith.constant 0 : i32
    %c0_i32_1 = arith.constant 0 : i32
    return %c0_i32, %c0_i32_0 : i32, i32
  }
  func.func @transform_4(%arg0: i32, %arg1: i32) -> (i32, i32) {
    %c0_i32 = arith.constant 0 : i32
    %c0_i32_0 = arith.constant 0 : i32
    %c0_i32_1 = arith.constant 0 : i32
    return %c0_i32, %c0_i32_0 : i32, i32
  }
  func.func @transform_5(%arg0: i32, %arg1: i32) -> (i32, i32) {
    %c0_i32 = arith.constant 0 : i32
    %c0_i32_0 = arith.constant 0 : i32
    %c0_i32_1 = arith.constant 0 : i32
    return %c0_i32, %c0_i32_0 : i32, i32
  }
  func.func @transform_6(%arg0: i32, %arg1: i32) -> (i32, i32) {
    %c0_i32 = arith.constant 0 : i32
    %c0_i32_0 = arith.constant 0 : i32
    %c0_i32_1 = arith.constant 0 : i32
    return %c0_i32, %c0_i32_0 : i32, i32
  }
  func.func @transform_7(%arg0: i32, %arg1: i32) -> (i32, i32, i32) {
    %c0_i32 = arith.constant 0 : i32
    %c0_i32_0 = arith.constant 0 : i32
    %c0_i32_1 = arith.constant 0 : i32
    %c0_i32_2 = arith.constant 0 : i32
    return %c0_i32, %c0_i32_0, %c0_i32_1 : i32, i32, i32
  }
  func.func @transform_8(%arg0: i32, %arg1: i32) -> (i32, i32) {
    %c0_i32 = arith.constant 0 : i32
    %c0_i32_0 = arith.constant 0 : i32
    %c0_i32_1 = arith.constant 0 : i32
    return %c0_i32, %c0_i32_0 : i32, i32
  }
  func.func @transform_9(%arg0: i32, %arg1: i32) -> (i32, i32, i32) {
    %c0_i32 = arith.constant 0 : i32
    %c0_i32_0 = arith.constant 0 : i32
    return %arg0, %arg1, %c0_i32 : i32, i32, i32
  }
}

module attributes {stable_mosaic.version = 11 : i64} {
  func.func @_mha_kernel(%arg0: i32, %arg1: i32, %arg2: memref<1x8x32xf32, #tpu.memory_space<vmem>>, %arg3: memref<1x8x32xf32, #tpu.memory_space<vmem>>, %arg4: memref<1x1x8xf32, #tpu.memory_space<vmem>>, %arg5: memref<32x32xf32, #tpu.memory_space<vmem>>, %arg6: memref<1x32xf32, #tpu.memory_space<vmem>>, %arg7: memref<32x64xf32, #tpu.memory_space<vmem>>, %arg8: memref<1x64xf32, #tpu.memory_space<vmem>>, %arg9: memref<2x16x32xf32, #tpu.memory_space<vmem>>, %arg10: memref<1x32xf32, #tpu.memory_space<vmem>>, %arg11: memref<1x8x32xf32, #tpu.memory_space<vmem>>) attributes {dimension_semantics = [#tpu.dimension_semantics<parallel>, #tpu.dimension_semantics<parallel>], iteration_bounds = array<i64: 2, 1>, scalar_prefetch = 0 : i64, scratch_operands = 0 : i64, tpu.core_type = #tpu.core_type<tc>, window_params = [{transform_indices = @transform_0, window_bounds = array<i64: 1, 8, 32>}, {transform_indices = @transform_1, window_bounds = array<i64: 1, 8, 32>}, {transform_indices = @transform_2, window_bounds = array<i64: 1, 1, 8>}, {pipeline_mode = #tpu.pipeline_mode<synchronous>, transform_indices = @transform_3, window_bounds = array<i64: 32, 32>}, {pipeline_mode = #tpu.pipeline_mode<synchronous>, transform_indices = @transform_4, window_bounds = array<i64: 1, 32>}, {pipeline_mode = #tpu.pipeline_mode<synchronous>, transform_indices = @transform_5, window_bounds = array<i64: 32, 64>}, {pipeline_mode = #tpu.pipeline_mode<synchronous>, transform_indices = @transform_6, window_bounds = array<i64: 1, 64>}, {pipeline_mode = #tpu.pipeline_mode<synchronous>, transform_indices = @transform_7, window_bounds = array<i64: 2, 16, 32>}, {pipeline_mode = #tpu.pipeline_mode<synchronous>, transform_indices = @transform_8, window_bounds = array<i64: 1, 32>}, {transform_indices = @transform_9, window_bounds = array<i64: 1, 8, 32>}]} {
    %c0 = arith.constant 0 : index
    %c0_0 = arith.constant 0 : index
    %c0_1 = arith.constant 0 : index
    %0 = vector.load %arg2[%c0, %c0_0, %c0_1] : memref<1x8x32xf32, #tpu.memory_space<vmem>>, vector<1x8x32xf32>
    %1 = vector.shape_cast %0 : vector<1x8x32xf32> to vector<8x32xf32>
    %2 = arith.truncf %1 : vector<8x32xf32> to vector<8x32xbf16>
    %c0_2 = arith.constant 0 : index
    %c0_3 = arith.constant 0 : index
    %c0_4 = arith.constant 0 : index
    %3 = vector.load %arg3[%c0_2, %c0_3, %c0_4] : memref<1x8x32xf32, #tpu.memory_space<vmem>>, vector<1x8x32xf32>
    %4 = vector.shape_cast %3 : vector<1x8x32xf32> to vector<8x32xf32>
    %5 = arith.truncf %4 : vector<8x32xf32> to vector<8x32xbf16>
    %c0_5 = arith.constant 0 : index
    %c0_6 = arith.constant 0 : index
    %c0_7 = arith.constant 0 : index
    %6 = vector.load %arg4[%c0_5, %c0_6, %c0_7] : memref<1x1x8xf32, #tpu.memory_space<vmem>>, vector<1x1x8xf32>
    %7 = vector.shape_cast %6 : vector<1x1x8xf32> to vector<1x8xf32>
    %cst = arith.constant 1.000000e+00 : f32
    %8 = vector.broadcast %cst : f32 to vector<1x8xf32>
    %9 = arith.subf %8, %7 : vector<1x8xf32>
    %c0_8 = arith.constant 0 : index
    %c0_9 = arith.constant 0 : index
    %10 = vector.load %arg5[%c0_8, %c0_9] : memref<32x32xf32, #tpu.memory_space<vmem>>, vector<32x32xf32>
    %11 = arith.truncf %10 : vector<32x32xf32> to vector<32x32xbf16>
    %cst_10 = arith.constant dense<0.000000e+00> : vector<8x32xf32>
    %12 = tpu.matmul %2, %11, %cst_10 {dimension_numbers = #tpu.dot_dimension_numbers<[1], [0], [0], [1], [0, 0, 1, 1], [], []>} : vector<8x32xbf16>, vector<32x32xbf16>, vector<8x32xf32> -> vector<8x32xf32>
    %c0_11 = arith.constant 0 : index
    %c0_12 = arith.constant 0 : index
    %13 = vector.load %arg6[%c0_11, %c0_12] : memref<1x32xf32, #tpu.memory_space<vmem>>, vector<1x32xf32>
    %14 = vector.broadcast %13 : vector<1x32xf32> to vector<8x32xf32>
    %15 = arith.addf %12, %14 : vector<8x32xf32>
    %c0_13 = arith.constant 0 : index
    %c0_14 = arith.constant 0 : index
    %16 = vector.load %arg7[%c0_13, %c0_14] : memref<32x64xf32, #tpu.memory_space<vmem>>, vector<32x64xf32>
    %17 = arith.truncf %16 : vector<32x64xf32> to vector<32x64xbf16>
    %cst_15 = arith.constant dense<0.000000e+00> : vector<8x64xf32>
    %18 = tpu.matmul %5, %17, %cst_15 {dimension_numbers = #tpu.dot_dimension_numbers<[1], [0], [0], [1], [0, 0, 1, 1], [], []>} : vector<8x32xbf16>, vector<32x64xbf16>, vector<8x64xf32> -> vector<8x64xf32>
    %c0_16 = arith.constant 0 : index
    %c0_17 = arith.constant 0 : index
    %19 = vector.load %arg8[%c0_16, %c0_17] : memref<1x64xf32, #tpu.memory_space<vmem>>, vector<1x64xf32>
    %20 = vector.broadcast %19 : vector<1x64xf32> to vector<8x64xf32>
    %21 = arith.addf %18, %20 : vector<8x64xf32>
    %22 = arith.truncf %15 : vector<8x32xf32> to vector<8x32xbf16>
    %23 = arith.truncf %21 : vector<8x64xf32> to vector<8x64xbf16>
    %cst_18 = arith.constant 0.000000e+00 : f32
    %24 = vector.broadcast %cst_18 : f32 to vector<8x32xf32>
    %25 = vector.extract_strided_slice %22 {offsets = [0, 0], sizes = [8, 16], strides = [1, 1]} : vector<8x32xbf16> to vector<8x16xbf16>
    %26 = vector.extract_strided_slice %23 {offsets = [0, 0], sizes = [8, 16], strides = [1, 1]} : vector<8x64xbf16> to vector<8x16xbf16>
    %27 = vector.extract_strided_slice %23 {offsets = [0, 32], sizes = [8, 16], strides = [1, 1]} : vector<8x64xbf16> to vector<8x16xbf16>
    %cst_19 = arith.constant dense<0.000000e+00> : vector<8x8xf32>
    %28 = tpu.matmul %25, %26, %cst_19 {dimension_numbers = #tpu.dot_dimension_numbers<[1], [1], [0], [0], [0, 0, 1, 0], [], []>} : vector<8x16xbf16>, vector<8x16xbf16>, vector<8x8xf32> -> vector<8x8xf32>
    %cst_20 = arith.constant 0.000000e+00 : f32
    %29 = vector.broadcast %cst_20 : f32 to vector<1x8xf32>
    %30 = arith.cmpf ogt, %7, %29 : vector<1x8xf32>
    %cst_21 = arith.constant -1.000000e+07 : f32
    %31 = vector.shape_cast %30 : vector<1x8xi1> to vector<1x8xi1>
    %32 = vector.broadcast %31 : vector<1x8xi1> to vector<8x8xi1>
    %33 = vector.broadcast %cst_21 : f32 to vector<8x8xf32>
    %34 = arith.select %32, %33, %28 : vector<8x8xi1>, vector<8x8xf32>
    %cst_22 = arith.constant dense<0xFF800000> : vector<8xf32>
    %35 = vector.multi_reduction <maximumf>, %34, %cst_22 [1] : vector<8x8xf32> to vector<8xf32>
    %36 = vector.shape_cast %35 : vector<8xf32> to vector<8x1xf32>
    %37 = vector.broadcast %36 : vector<8x1xf32> to vector<8x8xf32>
    %38 = arith.subf %34, %37 : vector<8x8xf32>
    %39 = math.exp %38 : vector<8x8xf32>
    %cst_23 = arith.constant dense<0.000000e+00> : vector<8xf32>
    %40 = vector.multi_reduction <add>, %39, %cst_23 [1] : vector<8x8xf32> to vector<8xf32>
    %41 = vector.shape_cast %40 : vector<8xf32> to vector<8x1xf32>
    %42 = tpu.reciprocal %41 {approx = true} : vector<8x1xf32> -> vector<8x1xf32>
    %43 = vector.broadcast %42 : vector<8x1xf32> to vector<8x8xf32>
    %44 = arith.mulf %39, %43 : vector<8x8xf32>
    %45 = vector.broadcast %9 : vector<1x8xf32> to vector<8x8xf32>
    %46 = arith.mulf %44, %45 : vector<8x8xf32>
    %47 = arith.truncf %46 : vector<8x8xf32> to vector<8x8xbf16>
    %cst_24 = arith.constant dense<0.000000e+00> : vector<8x16xf32>
    %48 = tpu.matmul %47, %27, %cst_24 {dimension_numbers = #tpu.dot_dimension_numbers<[1], [0], [0], [1], [0, 0, 1, 1], [], []>} : vector<8x8xbf16>, vector<8x16xbf16>, vector<8x16xf32> -> vector<8x16xf32>
    %49 = arith.truncf %48 : vector<8x16xf32> to vector<8x16xbf16>
    %c0_25 = arith.constant 0 : index
    %c0_26 = arith.constant 0 : index
    %c0_27 = arith.constant 0 : index
    %50 = vector.load %arg9[%c0_25, %c0_26, %c0_27] : memref<2x16x32xf32, #tpu.memory_space<vmem>>, vector<1x16x32xf32>
    %51 = vector.shape_cast %50 : vector<1x16x32xf32> to vector<16x32xf32>
    %52 = arith.truncf %51 : vector<16x32xf32> to vector<16x32xbf16>
    %cst_28 = arith.constant dense<0.000000e+00> : vector<8x32xf32>
    %53 = tpu.matmul %49, %52, %cst_28 {dimension_numbers = #tpu.dot_dimension_numbers<[1], [0], [0], [1], [0, 0, 1, 1], [], []>} : vector<8x16xbf16>, vector<16x32xbf16>, vector<8x32xf32> -> vector<8x32xf32>
    %54 = arith.addf %24, %53 : vector<8x32xf32>
    %55 = vector.extract_strided_slice %22 {offsets = [0, 16], sizes = [8, 16], strides = [1, 1]} : vector<8x32xbf16> to vector<8x16xbf16>
    %56 = vector.extract_strided_slice %23 {offsets = [0, 16], sizes = [8, 16], strides = [1, 1]} : vector<8x64xbf16> to vector<8x16xbf16>
    %57 = vector.extract_strided_slice %23 {offsets = [0, 48], sizes = [8, 16], strides = [1, 1]} : vector<8x64xbf16> to vector<8x16xbf16>
    %cst_29 = arith.constant dense<0.000000e+00> : vector<8x8xf32>
    %58 = tpu.matmul %55, %56, %cst_29 {dimension_numbers = #tpu.dot_dimension_numbers<[1], [1], [0], [0], [0, 0, 1, 0], [], []>} : vector<8x16xbf16>, vector<8x16xbf16>, vector<8x8xf32> -> vector<8x8xf32>
    %cst_30 = arith.constant 0.000000e+00 : f32
    %59 = vector.broadcast %cst_30 : f32 to vector<1x8xf32>
    %60 = arith.cmpf ogt, %7, %59 : vector<1x8xf32>
    %cst_31 = arith.constant -1.000000e+07 : f32
    %61 = vector.shape_cast %60 : vector<1x8xi1> to vector<1x8xi1>
    %62 = vector.broadcast %61 : vector<1x8xi1> to vector<8x8xi1>
    %63 = vector.broadcast %cst_31 : f32 to vector<8x8xf32>
    %64 = arith.select %62, %63, %58 : vector<8x8xi1>, vector<8x8xf32>
    %cst_32 = arith.constant dense<0xFF800000> : vector<8xf32>
    %65 = vector.multi_reduction <maximumf>, %64, %cst_32 [1] : vector<8x8xf32> to vector<8xf32>
    %66 = vector.shape_cast %65 : vector<8xf32> to vector<8x1xf32>
    %67 = vector.broadcast %66 : vector<8x1xf32> to vector<8x8xf32>
    %68 = arith.subf %64, %67 : vector<8x8xf32>
    %69 = math.exp %68 : vector<8x8xf32>
    %cst_33 = arith.constant dense<0.000000e+00> : vector<8xf32>
    %70 = vector.multi_reduction <add>, %69, %cst_33 [1] : vector<8x8xf32> to vector<8xf32>
    %71 = vector.shape_cast %70 : vector<8xf32> to vector<8x1xf32>
    %72 = tpu.reciprocal %71 {approx = true} : vector<8x1xf32> -> vector<8x1xf32>
    %73 = vector.broadcast %72 : vector<8x1xf32> to vector<8x8xf32>
    %74 = arith.mulf %69, %73 : vector<8x8xf32>
    %75 = vector.broadcast %9 : vector<1x8xf32> to vector<8x8xf32>
    %76 = arith.mulf %74, %75 : vector<8x8xf32>
    %77 = arith.truncf %76 : vector<8x8xf32> to vector<8x8xbf16>
    %cst_34 = arith.constant dense<0.000000e+00> : vector<8x16xf32>
    %78 = tpu.matmul %77, %57, %cst_34 {dimension_numbers = #tpu.dot_dimension_numbers<[1], [0], [0], [1], [0, 0, 1, 1], [], []>} : vector<8x8xbf16>, vector<8x16xbf16>, vector<8x16xf32> -> vector<8x16xf32>
    %79 = arith.truncf %78 : vector<8x16xf32> to vector<8x16xbf16>
    %c1 = arith.constant 1 : index
    %c0_35 = arith.constant 0 : index
    %c0_36 = arith.constant 0 : index
    %80 = vector.load %arg9[%c1, %c0_35, %c0_36] : memref<2x16x32xf32, #tpu.memory_space<vmem>>, vector<1x16x32xf32>
    %81 = vector.shape_cast %80 : vector<1x16x32xf32> to vector<16x32xf32>
    %82 = arith.truncf %81 : vector<16x32xf32> to vector<16x32xbf16>
    %cst_37 = arith.constant dense<0.000000e+00> : vector<8x32xf32>
    %83 = tpu.matmul %79, %82, %cst_37 {dimension_numbers = #tpu.dot_dimension_numbers<[1], [0], [0], [1], [0, 0, 1, 1], [], []>} : vector<8x16xbf16>, vector<16x32xbf16>, vector<8x32xf32> -> vector<8x32xf32>
    %84 = arith.addf %54, %83 : vector<8x32xf32>
    %c0_38 = arith.constant 0 : index
    %c0_39 = arith.constant 0 : index
    %85 = vector.load %arg10[%c0_38, %c0_39] : memref<1x32xf32, #tpu.memory_space<vmem>>, vector<1x32xf32>
    %86 = vector.broadcast %85 : vector<1x32xf32> to vector<8x32xf32>
    %87 = arith.addf %84, %86 : vector<8x32xf32>
    %c0_40 = arith.constant 0 : index
    %c0_41 = arith.constant 0 : index
    %c0_42 = arith.constant 0 : index
    %88 = vector.load %arg11[%c0_40, %c0_41, %c0_42] : memref<1x8x32xf32, #tpu.memory_space<vmem>>, vector<1x8x32xf32>
    %89 = vector.shape_cast %88 : vector<1x8x32xf32> to vector<8x32xf32>
    %90 = vector.shape_cast %87 : vector<8x32xf32> to vector<1x8x32xf32>
    tpu.vector_store %arg11[%c0_40, %c0_41, %c0_42], %90 {strides = array<i32>} : memref<1x8x32xf32, #tpu.memory_space<vmem>>, vector<1x8x32xf32>,
    return
  }
  func.func @transform_0(%arg0: i32, %arg1: i32) -> (i32, i32, i32) {
    %c0_i32 = arith.constant 0 : i32
    %c0_i32_0 = arith.constant 0 : i32
    return %arg0, %arg1, %c0_i32 : i32, i32, i32
  }
  func.func @transform_1(%arg0: i32, %arg1: i32) -> (i32, i32, i32) {
    %c0_i32 = arith.constant 0 : i32
    %c0_i32_0 = arith.constant 0 : i32
    %c0_i32_1 = arith.constant 0 : i32
    return %arg0, %c0_i32, %c0_i32_0 : i32, i32, i32
  }
  func.func @transform_2(%arg0: i32, %arg1: i32) -> (i32, i32, i32) {
    %c0_i32 = arith.constant 0 : i32
    %c0_i32_0 = arith.constant 0 : i32
    %c0_i32_1 = arith.constant 0 : i32
    return %arg0, %c0_i32, %c0_i32_0 : i32, i32, i32
  }
  func.func @transform_3(%arg0: i32, %arg1: i32) -> (i32, i32) {
    %c0_i32 = arith.constant 0 : i32
    %c0_i32_0 = arith.constant 0 : i32
    %c0_i32_1 = arith.constant 0 : i32
    return %c0_i32, %c0_i32_0 : i32, i32
  }
  func.func @transform_4(%arg0: i32, %arg1: i32) -> (i32, i32) {
    %c0_i32 = arith.constant 0 : i32
    %c0_i32_0 = arith.constant 0 : i32
    %c0_i32_1 = arith.constant 0 : i32
    return %c0_i32, %c0_i32_0 : i32, i32
  }
  func.func @transform_5(%arg0: i32, %arg1: i32) -> (i32, i32) {
    %c0_i32 = arith.constant 0 : i32
    %c0_i32_0 = arith.constant 0 : i32
    %c0_i32_1 = arith.constant 0 : i32
    return %c0_i32, %c0_i32_0 : i32, i32
  }
  func.func @transform_6(%arg0: i32, %arg1: i32) -> (i32, i32) {
    %c0_i32 = arith.constant 0 : i32
    %c0_i32_0 = arith.constant 0 : i32
    %c0_i32_1 = arith.constant 0 : i32
    return %c0_i32, %c0_i32_0 : i32, i32
  }
  func.func @transform_7(%arg0: i32, %arg1: i32) -> (i32, i32, i32) {
    %c0_i32 = arith.constant 0 : i32
    %c0_i32_0 = arith.constant 0 : i32
    %c0_i32_1 = arith.constant 0 : i32
    %c0_i32_2 = arith.constant 0 : i32
    return %c0_i32, %c0_i32_0, %c0_i32_1 : i32, i32, i32
  }
  func.func @transform_8(%arg0: i32, %arg1: i32) -> (i32, i32) {
    %c0_i32 = arith.constant 0 : i32
    %c0_i32_0 = arith.constant 0 : i32
    %c0_i32_1 = arith.constant 0 : i32
    return %c0_i32, %c0_i32_0 : i32, i32
  }
  func.func @transform_9(%arg0: i32, %arg1: i32) -> (i32, i32, i32) {
    %c0_i32 = arith.constant 0 : i32
    %c0_i32_0 = arith.constant 0 : i32
    return %arg0, %arg1, %c0_i32 : i32, i32, i32
  }
}

</mosaic_0001>

<bundles_post_ra>
// kernel: tpu_custom_call.1
= control target key start
LH: loop header
LB: loop body
LE: loop exit
PB: predicated region body
PF: predicated region fallthrough
CT: control target
= control target key end

     0   :  { %s1985_s0 = inlined_call_operand.hbm [shape: f32[2,8,32], index: 0, kind: input, shape index: {}]   ;;  %s1986_s1 = inlined_call_operand.hbm [shape: f32[2,8,32], index: 1, kind: input, shape index: {}]   ;;  %s1987_s2 = inlined_call_operand.vmem [shape: f32[2,1,8], index: 2, kind: input, shape index: {}]   ;;  %s1988_s3 = inlined_call_operand.hbm [shape: f32[32,32], index: 3, kind: input, shape index: {}]   ;;  %s1989_s4 = inlined_call_operand.vmem [shape: f32[1,32], index: 4, kind: input, shape index: {}]   ;;  %s1990_s5 = inlined_call_operand.hbm [shape: f32[32,64], index: 5, kind: input, shape index: {}]   ;;  %s1991_s6 = inlined_call_operand.vmem [shape: f32[1,64], index: 6, kind: input, shape index: {}]   ;;  %s1992_s7 = inlined_call_operand.hbm [shape: f32[2,16,32], index: 7, kind: input, shape index: {}]   ;;  %s1993_s8 = inlined_call_operand.vmem [shape: f32[1,32], index: 8, kind: input, shape index: {}]   ;;  %s1994_s9 = inlined_call_operand.hbm [shape: f32[2,8,32], index: 9, kind: output, shape index: {}]  }
   0x1   :  { %2002 = sst [smem:[#allocation19_spill]] %s1987_s2 }
   0x2   :  { %2003 = sst [smem:[#allocation20_spill]] %s1988_s3 }
   0x3   :  { %2004 = sst [smem:[#allocation21_spill]] %s1990_s5 }
   0x4   :  { %2005 = sst [smem:[#allocation22_spill]] %s1992_s7 }
   0x5   :  { %2006 = sst [smem:[#allocation23_spill]] %s1993_s8 }
   0x6   :  { %2007 = sst [smem:[#allocation24_spill]] %s1994_s9 }
   0x7   :  { %14 = vsyncpa [#allocation3], 0 }
   0x8   :  { %16 = vsyncpa [#allocation3 + $0x1], 0 }
   0x9   :  { %17 = vsyncpa [#allocation6], 0 }
   0xa   :  { %19 = vsyncpa [#allocation6 + $0x1], 0 }
   0xb   :  { %20 = vsyncpa [#allocation9], 0 }
   0xc   :  { %21 = vsyncpa [#allocation4], 0 }
   0xd   :  { %23 = vsyncpa [#allocation4 + $0x1], 0  ;;  %s1599_s30 = smov 0   ;;  %s1601_s10 = smov 0  }
   0xe   :  { %s1603_s11 = smov 0   ;;  %s1605_s12 = smov 0  }
   0xf   :  { %s1607_s13 = smov 0   ;;  %s1609_s14 = smov 0  }
  0x10 LB: > { %2008 = sst [smem:[#allocation17_spill]] %s1513_s30  ;;  %s1630_s15 = sadd.s32 4294967295, %s1533_s14   ;;  %s1533_s14 = sphi %s1609_s14, %s29_s14   ;;  %s1529_s13 = sphi %s1607_s13, %s2039_s13   ;;  %s1525_s12 = sphi %s1605_s12, %s2038_s12   ;;  %s1521_s11 = sphi %s1603_s11, %s2037_s11   ;;  %s1517_s10 = sphi %s1601_s10, %s2036_s10   ;;  %s1513_s30 = sphi %s1599_s30, %s2035_s30  }
  0x11   : > { %s1079_s16 = sadd.s32 4294967294, %s1533_s14   ;;  %p63_p0 = scmp.ne.s32.totalorder %s1517_s10, %s1513_s30 }
  0x12   : > { %p1996_p1 = scmp.eq.s32.totalorder %s1630_s15, 0  ;;  %p273_p3 = scmp.eq.s32.totalorder %s1079_s16, 1 }
  0x13   : > { %p1080_p5 = scmp.ge.s32.totalorder %s1533_s14, 1  ;;  %p280_p7 = scmp.lt.s32.totalorder %s1533_s14, 3 }
  0x14   : > { %p1639_p4 = por %p1996_p1, %p63_p0  ;;  %p1644_p6 = por %p273_p3, %p63_p0 }
  0x15   : > { %p1649_p8 = pnand %p1080_p5, %p280_p7  ;;  %s1535_s20 = smov [#allocation7]  }
  0x16   : > { %s2009_s17 = scalar_select %p1639_p4, 1, 0 }
  0x17   : > { %s2010_s18 = scalar_select %p1644_p6, 1, 0 }
  0x18   : > { %s2012_s19 = scalar_select %p1649_p8, 1, 0 }
  0x19   : > { %2011 = sst [smem:[#allocation18_spill]] %s2010_s18  ;;  %s292_s21 = sshll.u32 %s1535_s20, 4  ;;  %s1653_s21 = int_to_ptr.vmem [resolvable:$true] %s292_s21 }
  0x1a   : > { %p1199_p9 = pneg %p1649_p8  ;;  %s1536_s23 = smov [#allocation8]  }
  0x1b   : > { %s308_s24 = sshll.u32 %s1536_s23, 4  ;;  %s1537_s25 = smov [#allocation10]   ;;  %s1664_s24 = int_to_ptr.vmem [resolvable:$true] %s308_s24 }
  0x1c   : > { %p1660_p11 = pnand %p1199_p9, %p1996_p1  ;;  %s1666_s26 = sshll.u32 %s1537_s25, 4  ;;  %s325_s26 = int_to_ptr.vmem [resolvable:$true] %s1666_s26 }
  0x1d   : > { %s2014_s3 = sld [smem:[#allocation20_spill]] }
  0x1e   : > { %p1676_p13 = pneg %p1660_p11 }
  0x23   : > { %s1295_s29 = scalar_lea.hbm %s2014_s3, 512 }
  0x24   : > { %p1296_p12 = scmp.ne.s32.totalorder %s2014_s3, %s1295_s29  ;;  %p1302_p5 = scmp.lt.u32.totalorder %s1295_s29, %s2014_s3 }
  0x26   : > { %p1298_p0 = pnand %p1676_p13, %p1296_p12 }
  0x28   : > { %p1299_p3 = pneg %p1298_p0 }
  0x2a   : > { %p1304_p7 = pnand %p1302_p5, %p1299_p3 }
  0x2c   : > { %1307 = shalt.err (!%p1304_p7)
}
  0x2d   : > { %s1308_s27 = scalar_lea.vmem %s1653_s21, 512  ;;  %p1316_p2 = scmp.lt.s32.totalorder %s1653_s21, %s1653_s21 }
  0x2e   : > { %p1309_p9 = scmp.ne.s32.totalorder %s1653_s21, %s1308_s27  ;;  %p1317_p6 = scmp.lt.s32.totalorder %s1308_s27, %s1308_s27 }
  0x30   : > { %p1311_p10 = pnand %p1309_p9, %p1676_p13  ;;  %p1318_p12 = por %p1317_p6, %p1316_p2 }
  0x32   : > { %p1312_p1 = pneg %p1311_p10 }
  0x34   : > { %p1319_p0 = pnand %p1318_p12, %p1312_p1 }
  0x36   : > { %1322 = shalt.err (!%p1319_p0)
}
  0x37   : > { %s1538_s28 = smov 128   ;;  %s1539_s29 = smov 8  }
  0x38   : > { %1202 = dma.hbm_to_vmem [thread:$0]  (!%p1660_p11), %s2014_s3, 512, %s1653_s21, [#allocation6], %s1538_s28, %s1538_s28, %s1539_s29  }
  0x39   : > { %s2016_s5 = sld [smem:[#allocation21_spill]] }
  0x3f   : > { %s1323_s27 = scalar_lea.hbm %s2016_s5, 512 }
  0x40   : > { %p1324_p1 = scmp.ne.s32.totalorder %s2016_s5, %s1323_s27  ;;  %p1330_p10 = scmp.lt.u32.totalorder %s1323_s27, %s2016_s5 }
  0x42   : > { %p1326_p2 = pnand %p1324_p1, %p1676_p13 }
  0x44   : > { %p1327_p6 = pneg %p1326_p2 }
  0x46   : > { %p1332_p3 = pnand %p1330_p10, %p1327_p6 }
  0x48   : > { %1335 = shalt.err (!%p1332_p3)
}
  0x49   : > { %s1336_s21 = scalar_lea.vmem %s1664_s24, 512  ;;  %p1344_p12 = scmp.lt.s32.totalorder %s1664_s24, %s1664_s24 }
  0x4a   : > { %p1337_p5 = scmp.ne.s32.totalorder %s1664_s24, %s1336_s21  ;;  %p1345_p0 = scmp.lt.s32.totalorder %s1336_s21, %s1336_s21 }
  0x4c   : > { %p1339_p7 = pnand %p1337_p5, %p1676_p13  ;;  %p1346_p1 = por %p1345_p0, %p1344_p12 }
  0x4e   : > { %p1340_p9 = pneg %p1339_p7 }
  0x50   : > { %p1347_p2 = pnand %p1346_p1, %p1340_p9 }
  0x52   : > { %1350 = shalt.err (!%p1347_p2)
}
  0x53   : > { %1205 = dma.hbm_to_vmem [thread:$0]  (!%p1660_p11), %s2016_s5, 512, %s1664_s24, [#allocation9], %s1538_s28, %s1538_s28, %s1539_s29  }
  0x54   : > { %s2017_s7 = sld [smem:[#allocation22_spill]] }
  0x5a   : > { %s1351_s16 = scalar_lea.hbm %s2017_s7, 512 }
  0x5b   : > { %p1352_p6 = scmp.ne.s32.totalorder %s2017_s7, %s1351_s16  ;;  %p1358_p5 = scmp.lt.u32.totalorder %s1351_s16, %s2017_s7 }
  0x5d   : > { %p1354_p10 = pnand %p1352_p6, %p1676_p13 }
  0x5f   : > { %p1355_p3 = pneg %p1354_p10 }
  0x61   : > { %p1360_p7 = pnand %p1358_p5, %p1355_p3 }
  0x63   : > { %1363 = shalt.err (!%p1360_p7)
}
  0x64   : > { %s1364_s21 = scalar_lea.vmem %s325_s26, 512  ;;  %p1372_p1 = scmp.lt.s32.totalorder %s325_s26, %s325_s26 }
  0x65   : > { %p1365_p9 = scmp.ne.s32.totalorder %s325_s26, %s1364_s21  ;;  %p1373_p2 = scmp.lt.s32.totalorder %s1364_s21, %s1364_s21 }
  0x67   : > { %p1367_p12 = pnand %p1365_p9, %p1676_p13  ;;  %p1374_p4 = por %p1373_p2, %p1372_p1 }
  0x69   : > { %p1368_p0 = pneg %p1367_p12 }
  0x6b   : > { %p1375_p8 = pnand %p1374_p4, %p1368_p0 }
  0x6d   : > { %1378 = shalt.err (!%p1375_p8)
}
  0x6e   : > { %1208 = dma.hbm_to_vmem [thread:$0]  (!%p1660_p11), %s2017_s7, 512, %s325_s26, [#allocation9], %s1538_s28, %s1538_s28, %s1539_s29  }
  0x6f   : > { %s50_s18 = sadd.s32 1, %s1521_s11  ;;  %s41_s22 = sadd.s32 1, %s1529_s13 }
  0x70   : > { %p57_p4 = scmp.ne.s32.totalorder %s1521_s11, %s1517_s10  ;;  %p43_p8 = scmp.ge.s32.totalorder %s41_s22, 2 }
  0x71   : > { %p58_p13 = scmp.eq.s32.totalorder %s1533_s14, 0  ;;  %p2018_p6 = scmp.eq.s32.totalorder %s1630_s15, 1 }
  0x72   : > { %p1223_p3 = scmp.lt.s32.totalorder %s1533_s14, 2  ;;  %s2041_s22 = smov (%p43_p8, %s41_s22), 0 }
  0x73   : > { %p1755_p10 = por %p2018_p6, %p57_p4  ;;  %p59_p5 = por %p58_p13, %p57_p4 }
  0x74   : > { %s341_s9 = sand.u32 1, %s1521_s11   ;;  %s45_s30 = ssub.s32 %s1529_s13, %s2041_s22 }
  0x75   : > { %s2019_s8 = scalar_select %p1755_p10, 1, 0 }
  0x76   : > { %p48_p11 = scmp.eq.s32.totalorder %s45_s30, 0  ;;  %s1765_s26 = sshll.u32 %s341_s9, 3 }
  0x77   : > { %s1086_s28 = sshll.u32 %s1529_s13, 7  ;;  %s345_s25 = scalar_lea.vmem [#allocation2], %s1765_s26 }
  0x78   : > { %s1769_s29 = scalar_select %p48_p11, %s1521_s11, %s50_s18  }
  0x79   : > { %s1774_s23 = scalar_lea.hbm %s1985_s0, %s1086_s28  ;;  %s353_s27 = sshll.u32 %s345_s25, 4  ;;  %s1777_s27 = int_to_ptr.vmem [resolvable:$true] %s353_s27 }
  0x7a   : > { %p1781_p7 = pnand %p1223_p3, %p59_p5  ;;  %s1788_s18 = scalar_lea.hbm %s1986_s1, %s1086_s28 }
  0x7b   : > { %s360_s30 = sand.u32 1, %s1533_s14   ;;  %s342_s16 = scalar_lea.sflag [#allocation3], %s341_s9 }
  0x7c   : > { %s1379_s20 = scalar_lea.hbm %s1774_s23, 128  ;;  %p1381_p12 = pneg %p1781_p7 }
  0x7d   : > { %p1380_p9 = scmp.ne.s32.totalorder %s1774_s23, %s1379_s20  ;;  %s1384_s5 = scalar_lea.hbm %s1985_s0, 256 }
  0x7e   : > { %p1385_p2 = scmp.lt.u32.totalorder %s1774_s23, %s1985_s0  ;;  %p1386_p4 = scmp.lt.u32.totalorder %s1384_s5, %s1379_s20 }
  0x7f   : > { %p1382_p0 = pnand %p1381_p12, %p1380_p9  ;;  %p1388_p13 = scmp.lt.u32.totalorder %s1379_s20, %s1774_s23 }
  0x80   : > { %p1387_p8 = por %p1386_p4, %p1385_p2 }
  0x81   : > { %p1383_p1 = pneg %p1382_p0 }
  0x82   : > { %p1389_p6 = por %p1388_p13, %p1387_p8 }
  0x84   : > { %p1390_p3 = pnand %p1389_p6, %p1383_p1 }
  0x86   : > { %1393 = shalt.err (!%p1390_p3)
}
  0x87   : > { %s1394_s9 = scalar_lea.vmem %s1777_s27, 128  ;;  %s1540_s3 = smov [#allocation2]  }
  0x88   : > { %p1395_p5 = scmp.ne.s32.totalorder %s1777_s27, %s1394_s9  ;;  %s1399_s28 = sshll.u32 %s1540_s3, 4  ;;  %s1400_s28 = int_to_ptr.vmem [resolvable:$false] %s1399_s28 }
  0x89   : > { %s1401_s7 = scalar_lea.vmem %s1400_s28, 256  ;;  %p1402_p0 = scmp.lt.s32.totalorder %s1777_s27, %s1400_s28 }
  0x8a   : > { %p1397_p11 = pnand %p1395_p5, %p1381_p12  ;;  %p1403_p2 = scmp.lt.s32.totalorder %s1401_s7, %s1394_s9 }
  0x8c   : > { %p1398_p9 = pneg %p1397_p11  ;;  %p1404_p4 = por %p1403_p2, %p1402_p0 }
  0x8e   : > { %p1405_p8 = pnand %p1404_p4, %p1398_p9 }
  0x90   : > { %1408 = shalt.err (!%p1405_p8)
}
  0x91   : > { %1212 = dma.hbm_to_vmem [thread:$0]  (!%p1781_p7), %s1774_s23, 128, %s1777_s27, %s342_s16  }
  0x92   : > { %s364_s5 = scalar_lea.vmem [#allocation5], %s1765_s26  ;;  %s361_s20 = scalar_lea.sflag [#allocation6], %s360_s30 }
  0x93   : > { %s371_s2 = sshll.u32 %s364_s5, 4  ;;  %s1409_s25 = scalar_lea.hbm %s1788_s18, 128  ;;  %s372_s2 = int_to_ptr.vmem [resolvable:$true] %s371_s2 }
  0x94   : > { %p1410_p1 = scmp.ne.s32.totalorder %s1788_s18, %s1409_s25  ;;  %s1414_s3 = scalar_lea.hbm %s1986_s1, 256 }
  0x95   : > { %p1415_p3 = scmp.lt.u32.totalorder %s1788_s18, %s1986_s1  ;;  %p1416_p5 = scmp.lt.u32.totalorder %s1414_s3, %s1409_s25 }
  0x96   : > { %p1412_p13 = pnand %p1410_p1, %p1381_p12  ;;  %p1418_p9 = scmp.lt.u32.totalorder %s1409_s25, %s1788_s18 }
  0x97   : > { %p1417_p11 = por %p1416_p5, %p1415_p3 }
  0x98   : > { %p1413_p6 = pneg %p1412_p13 }
  0x99   : > { %p1419_p0 = por %p1418_p9, %p1417_p11 }
  0x9b   : > { %p1420_p2 = pnand %p1419_p0, %p1413_p6 }
  0x9d   : > { %1423 = shalt.err (!%p1420_p2)
}
  0x9e   : > { %s1424_s26 = scalar_lea.vmem %s372_s2, 128  ;;  %s1541_s23 = smov [#allocation5]  }
  0x9f   : > { %p1425_p4 = scmp.ne.s32.totalorder %s372_s2, %s1424_s26  ;;  %s1429_s27 = sshll.u32 %s1541_s23, 4  ;;  %s1430_s27 = int_to_ptr.vmem [resolvable:$false] %s1429_s27 }
  0xa0   : > { %s1431_s30 = scalar_lea.vmem %s1430_s27, 256  ;;  %p1432_p13 = scmp.lt.s32.totalorder %s372_s2, %s1430_s27 }
  0xa1   : > { %p1427_p8 = pnand %p1425_p4, %p1381_p12  ;;  %p1433_p10 = scmp.lt.s32.totalorder %s1431_s30, %s1424_s26 }
  0xa3   : > { %p1428_p1 = pneg %p1427_p8  ;;  %p1434_p3 = por %p1433_p10, %p1432_p13 }
  0xa5   : > { %p1435_p5 = pnand %p1434_p3, %p1428_p1 }
  0xa7   : > { %1438 = shalt.err (!%p1435_p5)
}
  0xa8   : > { %1215 = dma.hbm_to_vmem [thread:$0]  (!%p1781_p7), %s1788_s18, 128, %s372_s2, %s361_s20  }
  0xa9   : > { %p2021_p6 = scmp.ne.s32.totalorder %s2012_s19, 0 }
  0xaa   : > { %s1841_s16 = sand.u32 (!%p2021_p6), 1, %s1517_s10   ;;  %p2022_p10 = scmp.ne.s32.totalorder (!%p2021_p6), %s2009_s17, 0 }
  0xab   : > { %386 = sbr.rel (%p2021_p6) target bundleno = 1512 (0x5e8), region = 56  ;;  %s1844_s5 = sshll.u32 (!%p2021_p6), %s1841_s16, 3 }
  0xac   : > { %s389_s25 = scalar_lea.sflag (!%p2021_p6), [#allocation3], %s1841_s16  ;;  %s392_s24 = scalar_lea.vmem (!%p2021_p6), [#allocation2], %s1844_s5 }
  0xb2   : > { %1492 = dma.done.wait (%p2022_p10), %s389_s25, 128  }
  0xb3   : > { %1494 = vsyncadd (%p2022_p10), %s389_s25, 4294967168  ;;  %s397_s19 = sand.u32 1, %s1630_s15   ;;  %s401_s18 = scalar_lea.vmem [#allocation5], %s1844_s5 }
  0xb4   : > { %s398_s21 = scalar_lea.sflag [#allocation6], %s397_s19 }
  0xb5   : > { %1496 = dma.done.wait (%p2022_p10), %s398_s21, 128  }
  0xb6   : > { %1498 = vsyncadd (%p2022_p10), %s398_s21, 4294967168  ;;  %p2023_p7 = scmp.eq.s32.totalorder %s1630_s15, 0 }
  0xb8   : > { %1500 = dma.done.wait (%p2023_p7), [#allocation6], 512   ;;  %p2024_p12 = pmov %p2023_p7 }
  0xb9   : > { %p2025_p11 = pmov %p2023_p7 }
  0xba   : > { %1502 = vsyncadd (%p2024_p12), [#allocation6], 4294966784 }
  0xbb   : > { %1504 = dma.done.wait (%p2025_p11), [#allocation9], 1024   ;;  %p2026_p9 = pmov %p2023_p7 }
  0xbc   : > { %v1542_v0 = vmov 0.0   ;;  %vm1543_vm0 = vmmov 0   ;;  %v523_v1 = vld [vmem:[#allocation8] sm:$0xff]  ;;  %v524_v2 = vld [vmem:[#allocation8 + $0x8] sm:$0xff]  ;;  %v525_v3 = vld [vmem:[#allocation8 + $0x10] sm:$0xff]  ;;  %vm479_vm1 = vcmask 261120   ;;  %v630_v35 = vlaneseq }
  0xbd   : > { %1506 = vsyncadd (%p2026_p9), [#allocation9], 4294966272  ;;  %1137 = vmatprep.subr.bf16.mxu1 %v1542_v0  ;;  %1129 = vmatprep.subr.bf16.mxu0 %v1542_v0  ;;  %v527_v4 = vpack.c.bf16 %v524_v2, %v523_v1  ;;  %v526_v5 = vld [vmem:[#allocation8 + $0x18] sm:$0xff]  ;;  %v466_v6 = vld [vmem:[#allocation7] sm:$0xff]  ;;  %vm581_vm2 = vcmask 130048   ;;  %s1544_s9 = smov 112  }
  0xbe   : > { %1141 = vmatprep.mubr.msk.bf16.mxu1 %vm1543_vm0, %v1542_v0  ;;  %1133 = vmatprep.mubr.msk.bf16.mxu0 %vm1543_vm0, %v1542_v0  ;;  %v467_v7 = vld [vmem:[#allocation7 + $0x8] sm:$0xff]  ;;  %v468_v9 = vld [vmem:[#allocation7 + $0x10] sm:$0xff]  ;;  %v469_v10 = vld [vmem:[#allocation7 + $0x18] sm:$0xff]  ;;  %v528_v11 = vpack.c.bf16 %v526_v5, %v525_v3  ;;  %p456_p0 = scmp.lt.s32.totalorder %s1525_s12, 1  ;;  %s2027_s26 = sld [smem:[#allocation19_spill]]  ;;  %v631_v37 = vshrl.u32 %v630_v35, 7 }
  0xbf   : > { %v470_v8 = vpack.c.bf16 %v467_v7, %v466_v6  ;;  %1138 = vmatpush3.bf16.msra.mxu1 %v527_v4  ;;  %v462_v12 = vld [vmem:[%s401_s18] sm:$0xff]  ;;  %v471_v13 = vpack.c.bf16 %v469_v10, %v468_v9  ;;  %v460_v14 = vld [vmem:[%s392_s24] sm:$0xff]  ;;  %v1545_v39 = vmov 0   ;;  %vm636_vm5 = vcmask 64512   ;;  %s1546_s27 = smov 96   ;;  %s1547_s30 = smov 80  }
  0xc0   : > { %1139 = vmatprep.subr.bf16.mxu1 %v1542_v0  ;;  %v463_v15 = vpack.c.bf16 %v462_v12, %v462_v12  ;;  %v461_v16 = vpack.c.bf16 %v460_v14, %v460_v14  ;;  %v1098_v17 = vld [vmem:[%s1991_s6] ss:$0 sm:$0xff]  ;;  %s457_s3 = scalar_select %p456_p0, %s1525_s12, 1  ;;  %v632_v38 = vsub.s32 0, %v631_v37  ;;  %vm662_vm6 = vcmask 1043456   ;;  %v825_v10 = vld [vmem:[#allocation10 + $0x10] sm:$0xff] }
  0xc1   : > { %1130 = vmatpush3.bf16.msra.mxu0 %v470_v8  ;;  %v1096_v18 = vld [vmem:[%s1989_s4] ss:$0 sm:$0xff]  ;;  %s2028_s19 = sld [smem:[#allocation23_spill]]  ;;  %s1108_s21 = sshll.u32 %s1525_s12, 7 }
  0xc2   : > { %1131 = vmatprep.subr.bf16.mxu0 %v1542_v0  ;;  %s455_s18 = scalar_lea.vmem [#allocation11], %s1844_s5  ;;  %s2029_s20 = sld [smem:[#allocation24_spill]] }
  0xc3   : > { %1140 = vmatpush3.bf16.msra.mxu1 %v528_v11  ;;  %v826_v11 = vld [vmem:[#allocation10 + $0x18] sm:$0xff]  ;;  %s938_s15 = sshll.u32 %s455_s18, 4  ;;  %s924_s12 = scalar_lea.sflag [#allocation4], %s1841_s16  ;;  %s1937_s15 = int_to_ptr.vmem [resolvable:$true] %s938_s15 }
  0xc4   : > { %1151 = vmatprep.subr.bf16.mxu1 %v1542_v0  ;;  %s458_s23 = scalar_lea.vmem %s2027_s26, %s457_s3  ;;  %v827_v12 = vpack.c.bf16 %v826_v11, %v825_v10  ;;  %s1439_s5 = scalar_lea.vmem %s1937_s15, 128 }
  0xc5   : > { %1132 = vmatpush3.bf16.msra.mxu0 %v471_v13  ;;  %v464_v36 = vld [vmem:[%s458_s23] sm:$0x1]  ;;  %p1440_p2 = scmp.ne.s32.totalorder %s1937_s15, %s1439_s5  ;;  %p2030_p4 = scmp.ne.s32.totalorder %s2019_s8, 0 }
  0xc6   : > { %1145 = vmatprep.subr.bf16.mxu0 %v1542_v0  ;;  %1142 = vmatmul.mubr.msk.bf16.vlgmr.msra.gmra.mrb[0].mxu1 %vm479_vm1, %v463_v15  ;;  %vm628_vm3 = vcmp.gt.f32.partialorder %v464_v36, 0.0  ;;  %v465_v4 = vsub.f32 1.0, %v464_v36  ;;  %s1548_s3 = smov [#allocation11]  }
  0xc7   : > { %1153 = vmatprep.mubr.msk.bf16.mxu1 %vm1543_vm0, %v1542_v0  ;;  %v629_v40 = vsel %vm628_vm3, 1, %v1545_v39  ;;  %v1106_v37 = vld [vmem:[%s2028_s19] ss:$0 sm:$0xff]  ;;  %p1441_p8 = pnand %p1440_p2, %p2030_p4  ;;  %s1443_s28 = sshll.u32 %s1548_s3, 4  ;;  %s1444_s28 = int_to_ptr.vmem [resolvable:$false] %s1443_s28 }
  0xc8   : > { %1134 = vmatmul.mubr.msk.bf16.vlgmr.msra.gmra.mrb[0].mxu0 %vm479_vm1, %v461_v16  ;;  %v633_v41 = vrot.slane %v629_v40, %v632_v38  ;;  %v652_v5 = vrot.slane %v465_v4, %v632_v38  ;;  %s1445_s7 = scalar_lea.vmem %s1444_s28, 256  ;;  %p1446_p13 = scmp.lt.s32.totalorder %s1937_s15, %s1444_s28 }
  0xc9   : > { %1147 = vmatprep.mubr.msk.bf16.mxu0 %vm1543_vm0, %v1542_v0  ;;  %p1442_p1 = pneg %p1441_p8  ;;  %p1447_p3 = scmp.lt.s32.totalorder %s1445_s7, %s1439_s5 }
  0xca   : > { %vm634_vm4 = vcmp.eq.s32.totalorder %v633_v41, 1 }
  0xcb   : > { %p1448_p5 = por %p1447_p3, %p1446_p13 }
  0xcd   : > { %p1449_p6 = pnand %p1448_p5, %p1442_p1 }
 0x199   : > { %v573_v19 = vpop.f32.mrb[0].mxu1 }
 0x19a   : > { %v574_v20 = vadd.f32 %v1098_v17, %v573_v19  ;;  %v1143_v21 = vpop.f32.mrb[1].mxu1  ;;  %v708_v19 = vld [vmem:[#allocation10 + $0x8] sm:$0xff] }
 0x19b   : > { %v517_v22 = vpop.f32.mrb[0].mxu0  ;;  %v576_v23 = vpop.f32.mrb[2].mxu1 }
 0x19c   : > { %v518_v24 = vadd.f32 %v1096_v18, %v517_v22  ;;  %v1135_v25 = vpop.f32.mrb[1].mxu0  ;;  %v1890_v26 = vpack.c.bf16 %v574_v20, %v574_v20  ;;  %v1144_v27 = vpop.f32.mrb[3].mxu1  ;;  %v707_v18 = vld [vmem:[#allocation10] sm:$0xff] }
 0x19d   : > { %v520_v28 = vpop.f32.mrb[2].mxu0  ;;  %v709_v21 = vpack.c.bf16 %v708_v19, %v707_v18 }
 0x19e   : > { %v1136_v29 = vpop.f32.mrb[3].mxu0  ;;  %713 = vrot.lane.b32.xlu0 %v1890_v26, %s1544_s9  ;;  %v579_v30 = vpack.c.bf16 %v518_v24, %v518_v24  ;;  %v586_v31 = vsel %vm581_vm2, %v1890_v26, 0 }
 0x19f   : > { %1146 = vmatpush3.bf16.xpose.msra.mxu0 %v586_v31 }
 0x1a0   : > { %1157 = vmatprep.subr.bf16.mxu0 %v1542_v0 }
 0x1a2   : > { %711 = vrot.lane.b32.xlu0 %v579_v30, %s1544_s9  ;;  %s1935_s9 = scalar_lea.hbm %s2029_s20, %s1108_s21 }
 0x1a6   : > { %1148 = vmatmul.mubr.msk.bf16.vlgmr.msra.gmra.mrb[4].mxu0 %vm581_vm2, %v579_v30 }
 0x1a7   : > { %1159 = vmatprep.mubr.msk.bf16.mxu0 %vm1543_vm0, %v1542_v0 }
 0x210   : > { %v714_v32 = vpop.permute.xlu0 %713 }
 0x211   : > { %v719_v33 = vsel %vm581_vm2, %v714_v32, 0 }
 0x212   : > { %1158 = vmatpush3.bf16.xpose.msra.mxu0 %v719_v33 }
 0x213   : > { %1169 = vmatprep.subr.bf16.mxu0 %v1542_v0 }
 0x214   : > { %v712_v34 = vpop.permute.xlu0 %711 }
 0x219   : > { %1160 = vmatmul.mubr.msk.bf16.vlgmr.msra.gmra.mrb[8].mxu0 %vm581_vm2, %v712_v34 }
 0x21a   : > { %1171 = vmatprep.mubr.msk.bf16.mxu0 %vm1543_vm0, %v1542_v0  ;;  %1170 = vmatpush3.bf16.msra.mxu0 %v827_v12 }
 0x279   : > { %v622_v42 = vpop.f32.mrb[4].mxu0 }
 0x27a   : > { %v635_v43 = vsel %vm634_vm4, -10000000.0, %v622_v42  ;;  %v1149_v44 = vpop.f32.mrb[5].mxu0 }
 0x27b   : > { %v625_v45 = vpop.f32.mrb[6].mxu0  ;;  %v637_v46 = vsel %vm636_vm5, %v635_v43, -inf }
 0x27c   : > { %638 = vmax.xlane.f32.xlu1 %v637_v46  ;;  %v1150_v47 = vpop.f32.mrb[7].mxu0 }
 0x2ec   : > { %v755_v48 = vpop.f32.mrb[8].mxu0 }
 0x2ed   : > { %v761_v49 = vsel %vm634_vm4, -10000000.0, %v755_v48  ;;  %v1161_v50 = vpop.f32.mrb[9].mxu0 }
 0x2ee   : > { %v758_v51 = vpop.f32.mrb[10].mxu0  ;;  %v762_v52 = vsel %vm636_vm5, %v761_v49, -inf }
 0x2ef   : > { %763 = vmax.xlane.f32.xlu1 %v762_v52  ;;  %v1162_v53 = vpop.f32.mrb[11].mxu0 }
 0x300   : > { %657 = vrot.lane.b32.xlu1 %v1890_v26, %s1546_s27 }
 0x309   : > { %v639_v54 = vpop.xlane.xlu1 %638 }
 0x30a   : > { %v640_v55 = vsub.f32 %v635_v43, %v639_v54 }
 0x30c   : > { %v641_v56 = vmul.f32 1.442695, %v640_v55 }
 0x30e   : > { %1287 = vpow2.f32 %v641_v56 }
 0x318   : > { %v1288_v57 = vpop.eup %1287 }
 0x319   : > { %v643_v58 = vsel %vm636_vm5, %v1288_v57, 0.0 }
 0x31a   : > { %644 = vadd.xlane.f32.xlu0 %v643_v58 }
 0x37c   : > { %v764_v59 = vpop.xlane.xlu1 %763 }
 0x37d   : > { %v765_v60 = vsub.f32 %v761_v49, %v764_v59 }
 0x37f   : > { %v766_v61 = vmul.f32 1.442695, %v765_v60 }
 0x380   : > { %v658_v62 = vpop.permute.xlu1 %657 }
 0x381   : > { %1289 = vpow2.f32 %v766_v61  ;;  %v664_v63 = vsel %vm662_vm6, %v658_v62, 0 }
 0x382   : > { %1152 = vmatpush3.bf16.msra.mxu1 %v664_v63 }
 0x383   : > { %1163 = vmatprep.subr.bf16.mxu1 %v1542_v0 }
 0x38b   : > { %v1290_v1 = vpop.eup %1289 }
 0x38c   : > { %v768_v2 = vsel %vm636_vm5, %v1290_v1, 0.0 }
 0x38d   : > { %769 = vadd.xlane.f32.xlu1 %v768_v2 }
 0x39e   : > { %775 = vrot.lane.b32.xlu1 %v1890_v26, %s1547_s30 }
 0x3a7   : > { %v645_v3 = vpop.xlane.xlu0 %644 }
 0x3a8   : > { %1291 = vrcp.f32 %v645_v3 }
 0x3b2   : > { %v1292_v6 = vpop.eup %1291 }
 0x3b3   : > { %v647_v7 = vmul.f32 %v1292_v6, %v1288_v57 }
 0x3b5   : > { %v654_v8 = vmul.f32 %v652_v5, %v647_v7 }
 0x3b7   : > { %v655_v9 = vpack.c.bf16 %v654_v8, %v654_v8 }
 0x3b9   : > { %1154 = vmatmul.mubr.msk.bf16.vlgmr.msra.gmra.mrb[4].mxu1 %vm636_vm5, %v655_v9 }
 0x3ba   : > { %1165 = vmatprep.mubr.msk.bf16.mxu1 %vm1543_vm0, %v1542_v0 }
 0x41a   : > { %v770_v13 = vpop.xlane.xlu1 %769 }
 0x41b   : > { %1293 = vrcp.f32 %v770_v13 }
 0x41e   : > { %v776_v14 = vpop.permute.xlu1 %775 }
 0x41f   : > { %v781_v15 = vsel %vm662_vm6, %v776_v14, 0 }
 0x420   : > { %1164 = vmatpush3.bf16.msra.mxu1 %v781_v15 }
 0x421   : > { %1175 = vmatprep.subr.bf16.mxu1 %v1542_v0 }
 0x425   : > { %v1294_v16 = vpop.eup %1293 }
 0x426   : > { %v772_v17 = vmul.f32 %v1294_v16, %v1290_v1 }
 0x428   : > { %v773_v20 = vmul.f32 %v772_v17, %v652_v5 }
 0x42a   : > { %v774_v22 = vpack.c.bf16 %v773_v20, %v773_v20 }
 0x42c   : > { %1166 = vmatmul.mubr.msk.bf16.vlgmr.msra.gmra.mrb[8].mxu1 %vm636_vm5, %v774_v22 }
 0x42d   : > { %1176 = vmatpush3.bf16.msra.mxu1 %v709_v21  ;;  %1177 = vmatprep.mubr.msk.bf16.mxu1 %vm1543_vm0, %v1542_v0 }
 0x48c   : > { %v700_v23 = vpop.f32.mrb[4].mxu1 }
 0x48d   : > { %v706_v24 = vpack.c.bf16 %v700_v23, %v700_v23  ;;  %v1155_v25 = vpop.f32.mrb[5].mxu1 }
 0x48e   : > { %v703_v26 = vpop.f32.mrb[6].mxu1 }
 0x48f   : > { %v1156_v27 = vpop.f32.mrb[7].mxu1  ;;  %1178 = vmatmul.mubr.msk.bf16.vlgmr.msra.gmra.mrb[12].mxu1 %vm581_vm2, %v706_v24 }
 0x4ff   : > { %v817_v28 = vpop.f32.mrb[8].mxu1 }
 0x500   : > { %v823_v29 = vpack.c.bf16 %v817_v28, %v817_v28  ;;  %v1167_v30 = vpop.f32.mrb[9].mxu1 }
 0x501   : > { %v820_v31 = vpop.f32.mrb[10].mxu1 }
 0x502   : > { %v1168_v32 = vpop.f32.mrb[11].mxu1  ;;  %1172 = vmatmul.mubr.msk.bf16.vlgmr.msra.gmra.mrb[12].mxu0 %vm581_vm2, %v823_v29 }
 0x562   : > { %v908_v33 = vpop.f32.mrb[12].mxu1 }
 0x563   : > { %v1179_v34 = vpop.f32.mrb[13].mxu1 }
 0x564   : > { %v911_v0 = vpop.f32.mrb[14].mxu1 }
 0x565   : > { %v1180_v35 = vpop.f32.mrb[15].mxu1 }
 0x5d5   : > { %v865_v36 = vpop.f32.mrb[12].mxu0 }
 0x5d6   : > { %v909_v38 = vadd.f32 %v908_v33, %v865_v36  ;;  %v1173_v39 = vpop.f32.mrb[13].mxu0 }
 0x5d7   : > { %v868_v40 = vpop.f32.mrb[14].mxu0 }
 0x5d8   : > { %v921_v41 = vadd.f32 %v1106_v37, %v909_v38  ;;  %v1174_v42 = vpop.f32.mrb[15].mxu0 }
 0x5da   : > { %922 = vst.msk [vmem:[%s455_s18] sm:$0xff] %vm479_vm1, %v921_v41 }
 0x5db   : > { %1452 = shalt.err (!%p1449_p6)
}
 0x5dc   : > { %s1453_s16 = scalar_lea.hbm %s1935_s9, 128  ;;  %s1457_s27 = scalar_lea.hbm %s2029_s20, 256 }
 0x5dd   : > { %p1454_p10 = scmp.ne.s32.totalorder %s1935_s9, %s1453_s16  ;;  %p1458_p11 = scmp.lt.u32.totalorder %s1935_s9, %s2029_s20 }
 0x5de   : > { %p1459_p9 = scmp.lt.u32.totalorder %s1457_s27, %s1453_s16  ;;  %p1461_p2 = scmp.lt.u32.totalorder %s1453_s16, %s1935_s9 }
 0x5df   : > { %p1455_p7 = pnand %p1454_p10, %p2030_p4 }
 0x5e0   : > { %p1460_p0 = por %p1459_p9, %p1458_p11 }
 0x5e1   : > { %p1456_p12 = pneg %p1455_p7 }
 0x5e2   : > { %p1462_p8 = por %p1461_p2, %p1460_p0 }
 0x5e4   : > { %p1463_p1 = pnand %p1462_p8, %p1456_p12 }
 0x5e6   : > { %1466 = shalt.err (!%p1463_p1)
}
 0x5e7   : > { %1197 = dma.vmem_to_hbm [thread:$0]  (%p2030_p4), %s1937_s15, 128, %s1935_s9, %s924_s12  }
 0x5e8 PF: > { %s2031_s24 = sld [smem:[#allocation17_spill]]  ;;  %s2032_s19 = sld [smem:[#allocation18_spill]] }
 0x5e9   : > { %p2034_p3 = scmp.ge.s32.totalorder %s1533_s14, 2 }
 0x5ee   : > { %s950_s21 = sand.u32 1, %s2031_s24   ;;  %p2033_p13 = scmp.ne.s32.totalorder %s2032_s19, 0 }
 0x5ef   : > { %s951_s18 = scalar_lea.sflag [#allocation4], %s950_s21 }
 0x5f0   : > { %p1217_p5 = pnand %p2034_p3, %p2033_p13 }
 0x5f2   : > { %1508 = dma.done.wait (!%p1217_p5), %s951_s18, 128  }
 0x5f3   : > { %1510 = vsyncadd (!%p1217_p5), %s951_s18, 4294967168  ;;  %s29_s14 = sadd.s32 1, %s1533_s14   ;;  %s2035_s30 = smov %s1517_s10 }
 0x5f4   : > { %p26_p6 = scmp.ge.s32.totalorder %s29_s14, 4   ;;  %s2036_s10 = smov %s1521_s11 }
 0x5f5   : > { %s2037_s11 = smov %s1769_s29  ;;  %s2038_s12 = smov %s1529_s13 }
 0x5f6   : > { %s2039_s13 = smov %s2041_s22  ;;  %28 = sbr.rel (!%p26_p6) target bundleno = 16 (0x10), region = 130 }
 0x5fd   :  { %956 = vsyncpa [#allocation3], 1 }
 0x5fe   :  { %958 = vsyncpa [#allocation3 + $0x1], 1 }
 0x5ff   :  { %959 = vsyncpa [#allocation6], 1 }
 0x600   :  { %961 = vsyncpa [#allocation6 + $0x1], 1 }
 0x601   :  { %962 = vsyncpa [#allocation9], 1 }
 0x602   :  { %963 = vsyncpa [#allocation4], 1 }
 0x603   :  { %965 = vsyncpa [#allocation4 + $0x1], 1 }

// kernel: tpu_custom_call.1
= control target key start
LH: loop header
LB: loop body
LE: loop exit
PB: predicated region body
PF: predicated region fallthrough
CT: control target
= control target key end

     0   :  { %s1985_s0 = inlined_call_operand.hbm [shape: f32[2,8,32], index: 0, kind: input, shape index: {}]   ;;  %s1986_s1 = inlined_call_operand.hbm [shape: f32[2,8,32], index: 1, kind: input, shape index: {}]   ;;  %s1987_s2 = inlined_call_operand.vmem [shape: f32[2,1,8], index: 2, kind: input, shape index: {}]   ;;  %s1988_s3 = inlined_call_operand.hbm [shape: f32[32,32], index: 3, kind: input, shape index: {}]   ;;  %s1989_s4 = inlined_call_operand.vmem [shape: f32[1,32], index: 4, kind: input, shape index: {}]   ;;  %s1990_s5 = inlined_call_operand.hbm [shape: f32[32,64], index: 5, kind: input, shape index: {}]   ;;  %s1991_s6 = inlined_call_operand.vmem [shape: f32[1,64], index: 6, kind: input, shape index: {}]   ;;  %s1992_s7 = inlined_call_operand.hbm [shape: f32[2,16,32], index: 7, kind: input, shape index: {}]   ;;  %s1993_s8 = inlined_call_operand.vmem [shape: f32[1,32], index: 8, kind: input, shape index: {}]   ;;  %s1994_s9 = inlined_call_operand.hbm [shape: f32[2,8,32], index: 9, kind: output, shape index: {}]  }
   0x1   :  { %2002 = sst [smem:[#allocation19_spill]] %s1987_s2 }
   0x2   :  { %2003 = sst [smem:[#allocation20_spill]] %s1988_s3 }
   0x3   :  { %2004 = sst [smem:[#allocation21_spill]] %s1990_s5 }
   0x4   :  { %2005 = sst [smem:[#allocation22_spill]] %s1992_s7 }
   0x5   :  { %2006 = sst [smem:[#allocation23_spill]] %s1993_s8 }
   0x6   :  { %2007 = sst [smem:[#allocation24_spill]] %s1994_s9 }
   0x7   :  { %14 = vsyncpa [#allocation3], 0 }
   0x8   :  { %16 = vsyncpa [#allocation3 + $0x1], 0 }
   0x9   :  { %17 = vsyncpa [#allocation6], 0 }
   0xa   :  { %19 = vsyncpa [#allocation6 + $0x1], 0 }
   0xb   :  { %20 = vsyncpa [#allocation9], 0 }
   0xc   :  { %21 = vsyncpa [#allocation4], 0 }
   0xd   :  { %23 = vsyncpa [#allocation4 + $0x1], 0  ;;  %s1599_s30 = smov 0   ;;  %s1601_s10 = smov 0  }
   0xe   :  { %s1603_s11 = smov 0   ;;  %s1605_s12 = smov 0  }
   0xf   :  { %s1607_s13 = smov 0   ;;  %s1609_s14 = smov 0  }
  0x10 LB: > { %2008 = sst [smem:[#allocation17_spill]] %s1513_s30  ;;  %s1630_s15 = sadd.s32 4294967295, %s1533_s14   ;;  %s1533_s14 = sphi %s1609_s14, %s29_s14   ;;  %s1529_s13 = sphi %s1607_s13, %s2039_s13   ;;  %s1525_s12 = sphi %s1605_s12, %s2038_s12   ;;  %s1521_s11 = sphi %s1603_s11, %s2037_s11   ;;  %s1517_s10 = sphi %s1601_s10, %s2036_s10   ;;  %s1513_s30 = sphi %s1599_s30, %s2035_s30  }
  0x11   : > { %s1079_s16 = sadd.s32 4294967294, %s1533_s14   ;;  %p63_p0 = scmp.ne.s32.totalorder %s1517_s10, %s1513_s30 }
  0x12   : > { %p1996_p1 = scmp.eq.s32.totalorder %s1630_s15, 0  ;;  %p273_p3 = scmp.eq.s32.totalorder %s1079_s16, 1 }
  0x13   : > { %p1080_p5 = scmp.ge.s32.totalorder %s1533_s14, 1  ;;  %p280_p7 = scmp.lt.s32.totalorder %s1533_s14, 3 }
  0x14   : > { %p1639_p4 = por %p1996_p1, %p63_p0  ;;  %p1644_p6 = por %p273_p3, %p63_p0 }
  0x15   : > { %p1649_p8 = pnand %p1080_p5, %p280_p7  ;;  %s1535_s20 = smov [#allocation7]  }
  0x16   : > { %s2009_s17 = scalar_select %p1639_p4, 1, 0 }
  0x17   : > { %s2010_s18 = scalar_select %p1644_p6, 1, 0 }
  0x18   : > { %s2012_s19 = scalar_select %p1649_p8, 1, 0 }
  0x19   : > { %2011 = sst [smem:[#allocation18_spill]] %s2010_s18  ;;  %s292_s21 = sshll.u32 %s1535_s20, 4  ;;  %s1653_s21 = int_to_ptr.vmem [resolvable:$true] %s292_s21 }
  0x1a   : > { %p1199_p9 = pneg %p1649_p8  ;;  %s1536_s23 = smov [#allocation8]  }
  0x1b   : > { %s308_s24 = sshll.u32 %s1536_s23, 4  ;;  %s1537_s25 = smov [#allocation10]   ;;  %s1664_s24 = int_to_ptr.vmem [resolvable:$true] %s308_s24 }
  0x1c   : > { %p1660_p11 = pnand %p1199_p9, %p1996_p1  ;;  %s1666_s26 = sshll.u32 %s1537_s25, 4  ;;  %s325_s26 = int_to_ptr.vmem [resolvable:$true] %s1666_s26 }
  0x1d   : > { %s2014_s3 = sld [smem:[#allocation20_spill]] }
  0x1e   : > { %p1676_p13 = pneg %p1660_p11 }
  0x23   : > { %s1295_s29 = scalar_lea.hbm %s2014_s3, 512 }
  0x24   : > { %p1296_p12 = scmp.ne.s32.totalorder %s2014_s3, %s1295_s29  ;;  %p1302_p5 = scmp.lt.u32.totalorder %s1295_s29, %s2014_s3 }
  0x26   : > { %p1298_p0 = pnand %p1676_p13, %p1296_p12 }
  0x28   : > { %p1299_p3 = pneg %p1298_p0 }
  0x2a   : > { %p1304_p7 = pnand %p1302_p5, %p1299_p3 }
  0x2c   : > { %1307 = shalt.err (!%p1304_p7)
}
  0x2d   : > { %s1308_s27 = scalar_lea.vmem %s1653_s21, 512  ;;  %p1316_p2 = scmp.lt.s32.totalorder %s1653_s21, %s1653_s21 }
  0x2e   : > { %p1309_p9 = scmp.ne.s32.totalorder %s1653_s21, %s1308_s27  ;;  %p1317_p6 = scmp.lt.s32.totalorder %s1308_s27, %s1308_s27 }
  0x30   : > { %p1311_p10 = pnand %p1309_p9, %p1676_p13  ;;  %p1318_p12 = por %p1317_p6, %p1316_p2 }
  0x32   : > { %p1312_p1 = pneg %p1311_p10 }
  0x34   : > { %p1319_p0 = pnand %p1318_p12, %p1312_p1 }
  0x36   : > { %1322 = shalt.err (!%p1319_p0)
}
  0x37   : > { %s1538_s28 = smov 128   ;;  %s1539_s29 = smov 8  }
  0x38   : > { %1202 = dma.hbm_to_vmem [thread:$0]  (!%p1660_p11), %s2014_s3, 512, %s1653_s21, [#allocation6], %s1538_s28, %s1538_s28, %s1539_s29  }
  0x39   : > { %s2016_s5 = sld [smem:[#allocation21_spill]] }
  0x3f   : > { %s1323_s27 = scalar_lea.hbm %s2016_s5, 512 }
  0x40   : > { %p1324_p1 = scmp.ne.s32.totalorder %s2016_s5, %s1323_s27  ;;  %p1330_p10 = scmp.lt.u32.totalorder %s1323_s27, %s2016_s5 }
  0x42   : > { %p1326_p2 = pnand %p1324_p1, %p1676_p13 }
  0x44   : > { %p1327_p6 = pneg %p1326_p2 }
  0x46   : > { %p1332_p3 = pnand %p1330_p10, %p1327_p6 }
  0x48   : > { %1335 = shalt.err (!%p1332_p3)
}
  0x49   : > { %s1336_s21 = scalar_lea.vmem %s1664_s24, 512  ;;  %p1344_p12 = scmp.lt.s32.totalorder %s1664_s24, %s1664_s24 }
  0x4a   : > { %p1337_p5 = scmp.ne.s32.totalorder %s1664_s24, %s1336_s21  ;;  %p1345_p0 = scmp.lt.s32.totalorder %s1336_s21, %s1336_s21 }
  0x4c   : > { %p1339_p7 = pnand %p1337_p5, %p1676_p13  ;;  %p1346_p1 = por %p1345_p0, %p1344_p12 }
  0x4e   : > { %p1340_p9 = pneg %p1339_p7 }
  0x50   : > { %p1347_p2 = pnand %p1346_p1, %p1340_p9 }
  0x52   : > { %1350 = shalt.err (!%p1347_p2)
}
  0x53   : > { %1205 = dma.hbm_to_vmem [thread:$0]  (!%p1660_p11), %s2016_s5, 512, %s1664_s24, [#allocation9], %s1538_s28, %s1538_s28, %s1539_s29  }
  0x54   : > { %s2017_s7 = sld [smem:[#allocation22_spill]] }
  0x5a   : > { %s1351_s16 = scalar_lea.hbm %s2017_s7, 512 }
  0x5b   : > { %p1352_p6 = scmp.ne.s32.totalorder %s2017_s7, %s1351_s16  ;;  %p1358_p5 = scmp.lt.u32.totalorder %s1351_s16, %s2017_s7 }
  0x5d   : > { %p1354_p10 = pnand %p1352_p6, %p1676_p13 }
  0x5f   : > { %p1355_p3 = pneg %p1354_p10 }
  0x61   : > { %p1360_p7 = pnand %p1358_p5, %p1355_p3 }
  0x63   : > { %1363 = shalt.err (!%p1360_p7)
}
  0x64   : > { %s1364_s21 = scalar_lea.vmem %s325_s26, 512  ;;  %p1372_p1 = scmp.lt.s32.totalorder %s325_s26, %s325_s26 }
  0x65   : > { %p1365_p9 = scmp.ne.s32.totalorder %s325_s26, %s1364_s21  ;;  %p1373_p2 = scmp.lt.s32.totalorder %s1364_s21, %s1364_s21 }
  0x67   : > { %p1367_p12 = pnand %p1365_p9, %p1676_p13  ;;  %p1374_p4 = por %p1373_p2, %p1372_p1 }
  0x69   : > { %p1368_p0 = pneg %p1367_p12 }
  0x6b   : > { %p1375_p8 = pnand %p1374_p4, %p1368_p0 }
  0x6d   : > { %1378 = shalt.err (!%p1375_p8)
}
  0x6e   : > { %1208 = dma.hbm_to_vmem [thread:$0]  (!%p1660_p11), %s2017_s7, 512, %s325_s26, [#allocation9], %s1538_s28, %s1538_s28, %s1539_s29  }
  0x6f   : > { %s50_s18 = sadd.s32 1, %s1521_s11  ;;  %s41_s22 = sadd.s32 1, %s1529_s13 }
  0x70   : > { %p57_p4 = scmp.ne.s32.totalorder %s1521_s11, %s1517_s10  ;;  %p43_p8 = scmp.ge.s32.totalorder %s41_s22, 2 }
  0x71   : > { %p58_p13 = scmp.eq.s32.totalorder %s1533_s14, 0  ;;  %p2018_p6 = scmp.eq.s32.totalorder %s1630_s15, 1 }
  0x72   : > { %p1223_p3 = scmp.lt.s32.totalorder %s1533_s14, 2  ;;  %s2041_s22 = smov (%p43_p8, %s41_s22), 0 }
  0x73   : > { %p1755_p10 = por %p2018_p6, %p57_p4  ;;  %p59_p5 = por %p58_p13, %p57_p4 }
  0x74   : > { %s341_s9 = sand.u32 1, %s1521_s11   ;;  %s45_s30 = ssub.s32 %s1529_s13, %s2041_s22 }
  0x75   : > { %s2019_s8 = scalar_select %p1755_p10, 1, 0 }
  0x76   : > { %p48_p11 = scmp.eq.s32.totalorder %s45_s30, 0  ;;  %s1765_s26 = sshll.u32 %s341_s9, 3 }
  0x77   : > { %s1086_s28 = sshll.u32 %s1529_s13, 7  ;;  %s345_s25 = scalar_lea.vmem [#allocation2], %s1765_s26 }
  0x78   : > { %s1769_s29 = scalar_select %p48_p11, %s1521_s11, %s50_s18  }
  0x79   : > { %s1774_s23 = scalar_lea.hbm %s1985_s0, %s1086_s28  ;;  %s353_s27 = sshll.u32 %s345_s25, 4  ;;  %s1777_s27 = int_to_ptr.vmem [resolvable:$true] %s353_s27 }
  0x7a   : > { %p1781_p7 = pnand %p1223_p3, %p59_p5  ;;  %s1788_s18 = scalar_lea.hbm %s1986_s1, %s1086_s28 }
  0x7b   : > { %s360_s30 = sand.u32 1, %s1533_s14   ;;  %s342_s16 = scalar_lea.sflag [#allocation3], %s341_s9 }
  0x7c   : > { %s1379_s20 = scalar_lea.hbm %s1774_s23, 128  ;;  %p1381_p12 = pneg %p1781_p7 }
  0x7d   : > { %p1380_p9 = scmp.ne.s32.totalorder %s1774_s23, %s1379_s20  ;;  %s1384_s5 = scalar_lea.hbm %s1985_s0, 256 }
  0x7e   : > { %p1385_p2 = scmp.lt.u32.totalorder %s1774_s23, %s1985_s0  ;;  %p1386_p4 = scmp.lt.u32.totalorder %s1384_s5, %s1379_s20 }
  0x7f   : > { %p1382_p0 = pnand %p1381_p12, %p1380_p9  ;;  %p1388_p13 = scmp.lt.u32.totalorder %s1379_s20, %s1774_s23 }
  0x80   : > { %p1387_p8 = por %p1386_p4, %p1385_p2 }
  0x81   : > { %p1383_p1 = pneg %p1382_p0 }
  0x82   : > { %p1389_p6 = por %p1388_p13, %p1387_p8 }
  0x84   : > { %p1390_p3 = pnand %p1389_p6, %p1383_p1 }
  0x86   : > { %1393 = shalt.err (!%p1390_p3)
}
  0x87   : > { %s1394_s9 = scalar_lea.vmem %s1777_s27, 128  ;;  %s1540_s3 = smov [#allocation2]  }
  0x88   : > { %p1395_p5 = scmp.ne.s32.totalorder %s1777_s27, %s1394_s9  ;;  %s1399_s28 = sshll.u32 %s1540_s3, 4  ;;  %s1400_s28 = int_to_ptr.vmem [resolvable:$false] %s1399_s28 }
  0x89   : > { %s1401_s7 = scalar_lea.vmem %s1400_s28, 256  ;;  %p1402_p0 = scmp.lt.s32.totalorder %s1777_s27, %s1400_s28 }
  0x8a   : > { %p1397_p11 = pnand %p1395_p5, %p1381_p12  ;;  %p1403_p2 = scmp.lt.s32.totalorder %s1401_s7, %s1394_s9 }
  0x8c   : > { %p1398_p9 = pneg %p1397_p11  ;;  %p1404_p4 = por %p1403_p2, %p1402_p0 }
  0x8e   : > { %p1405_p8 = pnand %p1404_p4, %p1398_p9 }
  0x90   : > { %1408 = shalt.err (!%p1405_p8)
}
  0x91   : > { %1212 = dma.hbm_to_vmem [thread:$0]  (!%p1781_p7), %s1774_s23, 128, %s1777_s27, %s342_s16  }
  0x92   : > { %s364_s5 = scalar_lea.vmem [#allocation5], %s1765_s26  ;;  %s361_s20 = scalar_lea.sflag [#allocation6], %s360_s30 }
  0x93   : > { %s371_s2 = sshll.u32 %s364_s5, 4  ;;  %s1409_s25 = scalar_lea.hbm %s1788_s18, 128  ;;  %s372_s2 = int_to_ptr.vmem [resolvable:$true] %s371_s2 }
  0x94   : > { %p1410_p1 = scmp.ne.s32.totalorder %s1788_s18, %s1409_s25  ;;  %s1414_s3 = scalar_lea.hbm %s1986_s1, 256 }
  0x95   : > { %p1415_p3 = scmp.lt.u32.totalorder %s1788_s18, %s1986_s1  ;;  %p1416_p5 = scmp.lt.u32.totalorder %s1414_s3, %s1409_s25 }
  0x96   : > { %p1412_p13 = pnand %p1410_p1, %p1381_p12  ;;  %p1418_p9 = scmp.lt.u32.totalorder %s1409_s25, %s1788_s18 }
  0x97   : > { %p1417_p11 = por %p1416_p5, %p1415_p3 }
  0x98   : > { %p1413_p6 = pneg %p1412_p13 }
  0x99   : > { %p1419_p0 = por %p1418_p9, %p1417_p11 }
  0x9b   : > { %p1420_p2 = pnand %p1419_p0, %p1413_p6 }
  0x9d   : > { %1423 = shalt.err (!%p1420_p2)
}
  0x9e   : > { %s1424_s26 = scalar_lea.vmem %s372_s2, 128  ;;  %s1541_s23 = smov [#allocation5]  }
  0x9f   : > { %p1425_p4 = scmp.ne.s32.totalorder %s372_s2, %s1424_s26  ;;  %s1429_s27 = sshll.u32 %s1541_s23, 4  ;;  %s1430_s27 = int_to_ptr.vmem [resolvable:$false] %s1429_s27 }
  0xa0   : > { %s1431_s30 = scalar_lea.vmem %s1430_s27, 256  ;;  %p1432_p13 = scmp.lt.s32.totalorder %s372_s2, %s1430_s27 }
  0xa1   : > { %p1427_p8 = pnand %p1425_p4, %p1381_p12  ;;  %p1433_p10 = scmp.lt.s32.totalorder %s1431_s30, %s1424_s26 }
  0xa3   : > { %p1428_p1 = pneg %p1427_p8  ;;  %p1434_p3 = por %p1433_p10, %p1432_p13 }
  0xa5   : > { %p1435_p5 = pnand %p1434_p3, %p1428_p1 }
  0xa7   : > { %1438 = shalt.err (!%p1435_p5)
}
  0xa8   : > { %1215 = dma.hbm_to_vmem [thread:$0]  (!%p1781_p7), %s1788_s18, 128, %s372_s2, %s361_s20  }
  0xa9   : > { %p2021_p6 = scmp.ne.s32.totalorder %s2012_s19, 0 }
  0xaa   : > { %s1841_s16 = sand.u32 (!%p2021_p6), 1, %s1517_s10   ;;  %p2022_p10 = scmp.ne.s32.totalorder (!%p2021_p6), %s2009_s17, 0 }
  0xab   : > { %386 = sbr.rel (%p2021_p6) target bundleno = 1512 (0x5e8), region = 56  ;;  %s1844_s5 = sshll.u32 (!%p2021_p6), %s1841_s16, 3 }
  0xac   : > { %s389_s25 = scalar_lea.sflag (!%p2021_p6), [#allocation3], %s1841_s16  ;;  %s392_s24 = scalar_lea.vmem (!%p2021_p6), [#allocation2], %s1844_s5 }
  0xb2   : > { %1492 = dma.done.wait (%p2022_p10), %s389_s25, 128  }
  0xb3   : > { %1494 = vsyncadd (%p2022_p10), %s389_s25, 4294967168  ;;  %s397_s19 = sand.u32 1, %s1630_s15   ;;  %s401_s18 = scalar_lea.vmem [#allocation5], %s1844_s5 }
  0xb4   : > { %s398_s21 = scalar_lea.sflag [#allocation6], %s397_s19 }
  0xb5   : > { %1496 = dma.done.wait (%p2022_p10), %s398_s21, 128  }
  0xb6   : > { %1498 = vsyncadd (%p2022_p10), %s398_s21, 4294967168  ;;  %p2023_p7 = scmp.eq.s32.totalorder %s1630_s15, 0 }
  0xb8   : > { %1500 = dma.done.wait (%p2023_p7), [#allocation6], 512   ;;  %p2024_p12 = pmov %p2023_p7 }
  0xb9   : > { %p2025_p11 = pmov %p2023_p7 }
  0xba   : > { %1502 = vsyncadd (%p2024_p12), [#allocation6], 4294966784 }
  0xbb   : > { %1504 = dma.done.wait (%p2025_p11), [#allocation9], 1024   ;;  %p2026_p9 = pmov %p2023_p7 }
  0xbc   : > { %v1542_v0 = vmov 0.0   ;;  %vm1543_vm0 = vmmov 0   ;;  %v523_v1 = vld [vmem:[#allocation8] sm:$0xff]  ;;  %v524_v2 = vld [vmem:[#allocation8 + $0x8] sm:$0xff]  ;;  %v525_v3 = vld [vmem:[#allocation8 + $0x10] sm:$0xff]  ;;  %vm479_vm1 = vcmask 261120   ;;  %v630_v35 = vlaneseq }
  0xbd   : > { %1506 = vsyncadd (%p2026_p9), [#allocation9], 4294966272  ;;  %1137 = vmatprep.subr.bf16.mxu1 %v1542_v0  ;;  %1129 = vmatprep.subr.bf16.mxu0 %v1542_v0  ;;  %v527_v4 = vpack.c.bf16 %v524_v2, %v523_v1  ;;  %v526_v5 = vld [vmem:[#allocation8 + $0x18] sm:$0xff]  ;;  %v466_v6 = vld [vmem:[#allocation7] sm:$0xff]  ;;  %vm581_vm2 = vcmask 130048   ;;  %s1544_s9 = smov 112  }
  0xbe   : > { %1141 = vmatprep.mubr.msk.bf16.mxu1 %vm1543_vm0, %v1542_v0  ;;  %1133 = vmatprep.mubr.msk.bf16.mxu0 %vm1543_vm0, %v1542_v0  ;;  %v467_v7 = vld [vmem:[#allocation7 + $0x8] sm:$0xff]  ;;  %v468_v9 = vld [vmem:[#allocation7 + $0x10] sm:$0xff]  ;;  %v469_v10 = vld [vmem:[#allocation7 + $0x18] sm:$0xff]  ;;  %v528_v11 = vpack.c.bf16 %v526_v5, %v525_v3  ;;  %p456_p0 = scmp.lt.s32.totalorder %s1525_s12, 1  ;;  %s2027_s26 = sld [smem:[#allocation19_spill]]  ;;  %v631_v37 = vshrl.u32 %v630_v35, 7 }
  0xbf   : > { %v470_v8 = vpack.c.bf16 %v467_v7, %v466_v6  ;;  %1138 = vmatpush3.bf16.msra.mxu1 %v527_v4  ;;  %v462_v12 = vld [vmem:[%s401_s18] sm:$0xff]  ;;  %v471_v13 = vpack.c.bf16 %v469_v10, %v468_v9  ;;  %v460_v14 = vld [vmem:[%s392_s24] sm:$0xff]  ;;  %v1545_v39 = vmov 0   ;;  %vm636_vm5 = vcmask 64512   ;;  %s1546_s27 = smov 96   ;;  %s1547_s30 = smov 80  }
  0xc0   : > { %1139 = vmatprep.subr.bf16.mxu1 %v1542_v0  ;;  %v463_v15 = vpack.c.bf16 %v462_v12, %v462_v12  ;;  %v461_v16 = vpack.c.bf16 %v460_v14, %v460_v14  ;;  %v1098_v17 = vld [vmem:[%s1991_s6] ss:$0 sm:$0xff]  ;;  %s457_s3 = scalar_select %p456_p0, %s1525_s12, 1  ;;  %v632_v38 = vsub.s32 0, %v631_v37  ;;  %vm662_vm6 = vcmask 1043456   ;;  %v825_v10 = vld [vmem:[#allocation10 + $0x10] sm:$0xff] }
  0xc1   : > { %1130 = vmatpush3.bf16.msra.mxu0 %v470_v8  ;;  %v1096_v18 = vld [vmem:[%s1989_s4] ss:$0 sm:$0xff]  ;;  %s2028_s19 = sld [smem:[#allocation23_spill]]  ;;  %s1108_s21 = sshll.u32 %s1525_s12, 7 }
  0xc2   : > { %1131 = vmatprep.subr.bf16.mxu0 %v1542_v0  ;;  %s455_s18 = scalar_lea.vmem [#allocation11], %s1844_s5  ;;  %s2029_s20 = sld [smem:[#allocation24_spill]] }
  0xc3   : > { %1140 = vmatpush3.bf16.msra.mxu1 %v528_v11  ;;  %v826_v11 = vld [vmem:[#allocation10 + $0x18] sm:$0xff]  ;;  %s938_s15 = sshll.u32 %s455_s18, 4  ;;  %s924_s12 = scalar_lea.sflag [#allocation4], %s1841_s16  ;;  %s1937_s15 = int_to_ptr.vmem [resolvable:$true] %s938_s15 }
  0xc4   : > { %1151 = vmatprep.subr.bf16.mxu1 %v1542_v0  ;;  %s458_s23 = scalar_lea.vmem %s2027_s26, %s457_s3  ;;  %v827_v12 = vpack.c.bf16 %v826_v11, %v825_v10  ;;  %s1439_s5 = scalar_lea.vmem %s1937_s15, 128 }
  0xc5   : > { %1132 = vmatpush3.bf16.msra.mxu0 %v471_v13  ;;  %v464_v36 = vld [vmem:[%s458_s23] sm:$0x1]  ;;  %p1440_p2 = scmp.ne.s32.totalorder %s1937_s15, %s1439_s5  ;;  %p2030_p4 = scmp.ne.s32.totalorder %s2019_s8, 0 }
  0xc6   : > { %1145 = vmatprep.subr.bf16.mxu0 %v1542_v0  ;;  %1142 = vmatmul.mubr.msk.bf16.vlgmr.msra.gmra.mrb[0].mxu1 %vm479_vm1, %v463_v15  ;;  %vm628_vm3 = vcmp.gt.f32.partialorder %v464_v36, 0.0  ;;  %v465_v4 = vsub.f32 1.0, %v464_v36  ;;  %s1548_s3 = smov [#allocation11]  }
  0xc7   : > { %1153 = vmatprep.mubr.msk.bf16.mxu1 %vm1543_vm0, %v1542_v0  ;;  %v629_v40 = vsel %vm628_vm3, 1, %v1545_v39  ;;  %v1106_v37 = vld [vmem:[%s2028_s19] ss:$0 sm:$0xff]  ;;  %p1441_p8 = pnand %p1440_p2, %p2030_p4  ;;  %s1443_s28 = sshll.u32 %s1548_s3, 4  ;;  %s1444_s28 = int_to_ptr.vmem [resolvable:$false] %s1443_s28 }
  0xc8   : > { %1134 = vmatmul.mubr.msk.bf16.vlgmr.msra.gmra.mrb[0].mxu0 %vm479_vm1, %v461_v16  ;;  %v633_v41 = vrot.slane %v629_v40, %v632_v38  ;;  %v652_v5 = vrot.slane %v465_v4, %v632_v38  ;;  %s1445_s7 = scalar_lea.vmem %s1444_s28, 256  ;;  %p1446_p13 = scmp.lt.s32.totalorder %s1937_s15, %s1444_s28 }
  0xc9   : > { %1147 = vmatprep.mubr.msk.bf16.mxu0 %vm1543_vm0, %v1542_v0  ;;  %p1442_p1 = pneg %p1441_p8  ;;  %p1447_p3 = scmp.lt.s32.totalorder %s1445_s7, %s1439_s5 }
  0xca   : > { %vm634_vm4 = vcmp.eq.s32.totalorder %v633_v41, 1 }
  0xcb   : > { %p1448_p5 = por %p1447_p3, %p1446_p13 }
  0xcd   : > { %p1449_p6 = pnand %p1448_p5, %p1442_p1 }
 0x199   : > { %v573_v19 = vpop.f32.mrb[0].mxu1 }
 0x19a   : > { %v574_v20 = vadd.f32 %v1098_v17, %v573_v19  ;;  %v1143_v21 = vpop.f32.mrb[1].mxu1  ;;  %v708_v19 = vld [vmem:[#allocation10 + $0x8] sm:$0xff] }
 0x19b   : > { %v517_v22 = vpop.f32.mrb[0].mxu0  ;;  %v576_v23 = vpop.f32.mrb[2].mxu1 }
 0x19c   : > { %v518_v24 = vadd.f32 %v1096_v18, %v517_v22  ;;  %v1135_v25 = vpop.f32.mrb[1].mxu0  ;;  %v1890_v26 = vpack.c.bf16 %v574_v20, %v574_v20  ;;  %v1144_v27 = vpop.f32.mrb[3].mxu1  ;;  %v707_v18 = vld [vmem:[#allocation10] sm:$0xff] }
 0x19d   : > { %v520_v28 = vpop.f32.mrb[2].mxu0  ;;  %v709_v21 = vpack.c.bf16 %v708_v19, %v707_v18 }
 0x19e   : > { %v1136_v29 = vpop.f32.mrb[3].mxu0  ;;  %713 = vrot.lane.b32.xlu0 %v1890_v26, %s1544_s9  ;;  %v579_v30 = vpack.c.bf16 %v518_v24, %v518_v24  ;;  %v586_v31 = vsel %vm581_vm2, %v1890_v26, 0 }
 0x19f   : > { %1146 = vmatpush3.bf16.xpose.msra.mxu0 %v586_v31 }
 0x1a0   : > { %1157 = vmatprep.subr.bf16.mxu0 %v1542_v0 }
 0x1a2   : > { %711 = vrot.lane.b32.xlu0 %v579_v30, %s1544_s9  ;;  %s1935_s9 = scalar_lea.hbm %s2029_s20, %s1108_s21 }
 0x1a6   : > { %1148 = vmatmul.mubr.msk.bf16.vlgmr.msra.gmra.mrb[4].mxu0 %vm581_vm2, %v579_v30 }
 0x1a7   : > { %1159 = vmatprep.mubr.msk.bf16.mxu0 %vm1543_vm0, %v1542_v0 }
 0x210   : > { %v714_v32 = vpop.permute.xlu0 %713 }
 0x211   : > { %v719_v33 = vsel %vm581_vm2, %v714_v32, 0 }
 0x212   : > { %1158 = vmatpush3.bf16.xpose.msra.mxu0 %v719_v33 }
 0x213   : > { %1169 = vmatprep.subr.bf16.mxu0 %v1542_v0 }
 0x214   : > { %v712_v34 = vpop.permute.xlu0 %711 }
 0x219   : > { %1160 = vmatmul.mubr.msk.bf16.vlgmr.msra.gmra.mrb[8].mxu0 %vm581_vm2, %v712_v34 }
 0x21a   : > { %1171 = vmatprep.mubr.msk.bf16.mxu0 %vm1543_vm0, %v1542_v0  ;;  %1170 = vmatpush3.bf16.msra.mxu0 %v827_v12 }
 0x279   : > { %v622_v42 = vpop.f32.mrb[4].mxu0 }
 0x27a   : > { %v635_v43 = vsel %vm634_vm4, -10000000.0, %v622_v42  ;;  %v1149_v44 = vpop.f32.mrb[5].mxu0 }
 0x27b   : > { %v625_v45 = vpop.f32.mrb[6].mxu0  ;;  %v637_v46 = vsel %vm636_vm5, %v635_v43, -inf }
 0x27c   : > { %638 = vmax.xlane.f32.xlu1 %v637_v46  ;;  %v1150_v47 = vpop.f32.mrb[7].mxu0 }
 0x2ec   : > { %v755_v48 = vpop.f32.mrb[8].mxu0 }
 0x2ed   : > { %v761_v49 = vsel %vm634_vm4, -10000000.0, %v755_v48  ;;  %v1161_v50 = vpop.f32.mrb[9].mxu0 }
 0x2ee   : > { %v758_v51 = vpop.f32.mrb[10].mxu0  ;;  %v762_v52 = vsel %vm636_vm5, %v761_v49, -inf }
 0x2ef   : > { %763 = vmax.xlane.f32.xlu1 %v762_v52  ;;  %v1162_v53 = vpop.f32.mrb[11].mxu0 }
 0x300   : > { %657 = vrot.lane.b32.xlu1 %v1890_v26, %s1546_s27 }
 0x309   : > { %v639_v54 = vpop.xlane.xlu1 %638 }
 0x30a   : > { %v640_v55 = vsub.f32 %v635_v43, %v639_v54 }
 0x30c   : > { %v641_v56 = vmul.f32 1.442695, %v640_v55 }
 0x30e   : > { %1287 = vpow2.f32 %v641_v56 }
 0x318   : > { %v1288_v57 = vpop.eup %1287 }
 0x319   : > { %v643_v58 = vsel %vm636_vm5, %v1288_v57, 0.0 }
 0x31a   : > { %644 = vadd.xlane.f32.xlu0 %v643_v58 }
 0x37c   : > { %v764_v59 = vpop.xlane.xlu1 %763 }
 0x37d   : > { %v765_v60 = vsub.f32 %v761_v49, %v764_v59 }
 0x37f   : > { %v766_v61 = vmul.f32 1.442695, %v765_v60 }
 0x380   : > { %v658_v62 = vpop.permute.xlu1 %657 }
 0x381   : > { %1289 = vpow2.f32 %v766_v61  ;;  %v664_v63 = vsel %vm662_vm6, %v658_v62, 0 }
 0x382   : > { %1152 = vmatpush3.bf16.msra.mxu1 %v664_v63 }
 0x383   : > { %1163 = vmatprep.subr.bf16.mxu1 %v1542_v0 }
 0x38b   : > { %v1290_v1 = vpop.eup %1289 }
 0x38c   : > { %v768_v2 = vsel %vm636_vm5, %v1290_v1, 0.0 }
 0x38d   : > { %769 = vadd.xlane.f32.xlu1 %v768_v2 }
 0x39e   : > { %775 = vrot.lane.b32.xlu1 %v1890_v26, %s1547_s30 }
 0x3a7   : > { %v645_v3 = vpop.xlane.xlu0 %644 }
 0x3a8   : > { %1291 = vrcp.f32 %v645_v3 }
 0x3b2   : > { %v1292_v6 = vpop.eup %1291 }
 0x3b3   : > { %v647_v7 = vmul.f32 %v1292_v6, %v1288_v57 }
 0x3b5   : > { %v654_v8 = vmul.f32 %v652_v5, %v647_v7 }
 0x3b7   : > { %v655_v9 = vpack.c.bf16 %v654_v8, %v654_v8 }
 0x3b9   : > { %1154 = vmatmul.mubr.msk.bf16.vlgmr.msra.gmra.mrb[4].mxu1 %vm636_vm5, %v655_v9 }
 0x3ba   : > { %1165 = vmatprep.mubr.msk.bf16.mxu1 %vm1543_vm0, %v1542_v0 }
 0x41a   : > { %v770_v13 = vpop.xlane.xlu1 %769 }
 0x41b   : > { %1293 = vrcp.f32 %v770_v13 }
 0x41e   : > { %v776_v14 = vpop.permute.xlu1 %775 }
 0x41f   : > { %v781_v15 = vsel %vm662_vm6, %v776_v14, 0 }
 0x420   : > { %1164 = vmatpush3.bf16.msra.mxu1 %v781_v15 }
 0x421   : > { %1175 = vmatprep.subr.bf16.mxu1 %v1542_v0 }
 0x425   : > { %v1294_v16 = vpop.eup %1293 }
 0x426   : > { %v772_v17 = vmul.f32 %v1294_v16, %v1290_v1 }
 0x428   : > { %v773_v20 = vmul.f32 %v772_v17, %v652_v5 }
 0x42a   : > { %v774_v22 = vpack.c.bf16 %v773_v20, %v773_v20 }
 0x42c   : > { %1166 = vmatmul.mubr.msk.bf16.vlgmr.msra.gmra.mrb[8].mxu1 %vm636_vm5, %v774_v22 }
 0x42d   : > { %1176 = vmatpush3.bf16.msra.mxu1 %v709_v21  ;;  %1177 = vmatprep.mubr.msk.bf16.mxu1 %vm1543_vm0, %v1542_v0 }
 0x48c   : > { %v700_v23 = vpop.f32.mrb[4].mxu1 }
 0x48d   : > { %v706_v24 = vpack.c.bf16 %v700_v23, %v700_v23  ;;  %v1155_v25 = vpop.f32.mrb[5].mxu1 }
 0x48e   : > { %v703_v26 = vpop.f32.mrb[6].mxu1 }
 0x48f   : > { %v1156_v27 = vpop.f32.mrb[7].mxu1  ;;  %1178 = vmatmul.mubr.msk.bf16.vlgmr.msra.gmra.mrb[12].mxu1 %vm581_vm2, %v706_v24 }
 0x4ff   : > { %v817_v28 = vpop.f32.mrb[8].mxu1 }
 0x500   : > { %v823_v29 = vpack.c.bf16 %v817_v28, %v817_v28  ;;  %v1167_v30 = vpop.f32.mrb[9].mxu1 }
 0x501   : > { %v820_v31 = vpop.f32.mrb[10].mxu1 }
 0x502   : > { %v1168_v32 = vpop.f32.mrb[11].mxu1  ;;  %1172 = vmatmul.mubr.msk.bf16.vlgmr.msra.gmra.mrb[12].mxu0 %vm581_vm2, %v823_v29 }
 0x562   : > { %v908_v33 = vpop.f32.mrb[12].mxu1 }
 0x563   : > { %v1179_v34 = vpop.f32.mrb[13].mxu1 }
 0x564   : > { %v911_v0 = vpop.f32.mrb[14].mxu1 }
 0x565   : > { %v1180_v35 = vpop.f32.mrb[15].mxu1 }
 0x5d5   : > { %v865_v36 = vpop.f32.mrb[12].mxu0 }
 0x5d6   : > { %v909_v38 = vadd.f32 %v908_v33, %v865_v36  ;;  %v1173_v39 = vpop.f32.mrb[13].mxu0 }
 0x5d7   : > { %v868_v40 = vpop.f32.mrb[14].mxu0 }
 0x5d8   : > { %v921_v41 = vadd.f32 %v1106_v37, %v909_v38  ;;  %v1174_v42 = vpop.f32.mrb[15].mxu0 }
 0x5da   : > { %922 = vst.msk [vmem:[%s455_s18] sm:$0xff] %vm479_vm1, %v921_v41 }
 0x5db   : > { %1452 = shalt.err (!%p1449_p6)
}
 0x5dc   : > { %s1453_s16 = scalar_lea.hbm %s1935_s9, 128  ;;  %s1457_s27 = scalar_lea.hbm %s2029_s20, 256 }
 0x5dd   : > { %p1454_p10 = scmp.ne.s32.totalorder %s1935_s9, %s1453_s16  ;;  %p1458_p11 = scmp.lt.u32.totalorder %s1935_s9, %s2029_s20 }
 0x5de   : > { %p1459_p9 = scmp.lt.u32.totalorder %s1457_s27, %s1453_s16  ;;  %p1461_p2 = scmp.lt.u32.totalorder %s1453_s16, %s1935_s9 }
 0x5df   : > { %p1455_p7 = pnand %p1454_p10, %p2030_p4 }
 0x5e0   : > { %p1460_p0 = por %p1459_p9, %p1458_p11 }
 0x5e1   : > { %p1456_p12 = pneg %p1455_p7 }
 0x5e2   : > { %p1462_p8 = por %p1461_p2, %p1460_p0 }
 0x5e4   : > { %p1463_p1 = pnand %p1462_p8, %p1456_p12 }
 0x5e6   : > { %1466 = shalt.err (!%p1463_p1)
}
 0x5e7   : > { %1197 = dma.vmem_to_hbm [thread:$0]  (%p2030_p4), %s1937_s15, 128, %s1935_s9, %s924_s12  }
 0x5e8 PF: > { %s2031_s24 = sld [smem:[#allocation17_spill]]  ;;  %s2032_s19 = sld [smem:[#allocation18_spill]] }
 0x5e9   : > { %p2034_p3 = scmp.ge.s32.totalorder %s1533_s14, 2 }
 0x5ee   : > { %s950_s21 = sand.u32 1, %s2031_s24   ;;  %p2033_p13 = scmp.ne.s32.totalorder %s2032_s19, 0 }
 0x5ef   : > { %s951_s18 = scalar_lea.sflag [#allocation4], %s950_s21 }
 0x5f0   : > { %p1217_p5 = pnand %p2034_p3, %p2033_p13 }
 0x5f2   : > { %1508 = dma.done.wait (!%p1217_p5), %s951_s18, 128  }
 0x5f3   : > { %1510 = vsyncadd (!%p1217_p5), %s951_s18, 4294967168  ;;  %s29_s14 = sadd.s32 1, %s1533_s14   ;;  %s2035_s30 = smov %s1517_s10 }
 0x5f4   : > { %p26_p6 = scmp.ge.s32.totalorder %s29_s14, 4   ;;  %s2036_s10 = smov %s1521_s11 }
 0x5f5   : > { %s2037_s11 = smov %s1769_s29  ;;  %s2038_s12 = smov %s1529_s13 }
 0x5f6   : > { %s2039_s13 = smov %s2041_s22  ;;  %28 = sbr.rel (!%p26_p6) target bundleno = 16 (0x10), region = 130 }
 0x5fd   :  { %956 = vsyncpa [#allocation3], 1 }
 0x5fe   :  { %958 = vsyncpa [#allocation3 + $0x1], 1 }
 0x5ff   :  { %959 = vsyncpa [#allocation6], 1 }
 0x600   :  { %961 = vsyncpa [#allocation6 + $0x1], 1 }
 0x601   :  { %962 = vsyncpa [#allocation9], 1 }
 0x602   :  { %963 = vsyncpa [#allocation4], 1 }
 0x603   :  { %965 = vsyncpa [#allocation4 + $0x1], 1 }

</bundles_post_ra>
